<compile_context>
chip_gen: v7x
topology: tpu7x:2x2x1
jax: 0.10.0
libtpu: 0.0.40
codegen_flags: <defaults>
</compile_context>

<pallas_src>
import jax
import jax.numpy as jnp
from jax.experimental import pallas as pl
from jax.experimental.pallas import tpu as pltpu


# ----------------------------------------------------------------------------
# Pallas kernel: one (G * P_PAD, D) slab-batch per grid step.  All operands are
# rank-2, so every matmul is a single MXU dot.
# ----------------------------------------------------------------------------
def gcb_kernel(a_ref, pool_ref, x_ref, w1_ref, b1_ref, w2_ref, b2_ref,
               w3_ref, b3_ref, o_ref):
    bf16 = jnp.bfloat16
    A = a_ref[...]                       # (GP, GP) block-diag kron(I_G, A_norm), bf16
    x = x_ref[...]                       # (GP, D)  G stacked (b,t) joint slabs, bf16

    # --- input graph conv:  ReLU(BN(A @ x @ W1 + b1))  (BN folded into W1/b1) ---
    h = jnp.dot(A, x, preferred_element_type=jnp.float32)               # (GP, D)
    h = jnp.dot(h.astype(bf16), w1_ref[...],
                preferred_element_type=jnp.float32) + b1_ref[...]       # (GP, E)
    h = jnp.maximum(h, 0.0)

    # --- residual graph-conv block (two graph convs), BN folded ---
    r = jnp.dot(A, h.astype(bf16), preferred_element_type=jnp.float32)
    r = jnp.dot(r.astype(bf16), w2_ref[...],
                preferred_element_type=jnp.float32) + b2_ref[...]
    r = jnp.maximum(r, 0.0)
    r = jnp.dot(A, r.astype(bf16), preferred_element_type=jnp.float32)
    r = jnp.dot(r.astype(bf16), w3_ref[...],
                preferred_element_type=jnp.float32) + b3_ref[...]
    r = jnp.maximum(r, 0.0)
    h = h + r                            # residual connection, (GP, E) f32

    # --- 'mean' pooling over the joint axis as an MXU matmul: (G, GP)@(GP, E) ---
    # pool_ref rows hold 1/P over the real joints of slab g and 0 elsewhere, so
    # zero-padded joint rows (which only carry relu(bias) junk) never reach the
    # output, and the divisor is the true joint count.
    o_ref[...] = jnp.dot(pool_ref[...], h, preferred_element_type=jnp.float32)


# ----------------------------------------------------------------------------
# Wrapper (glue): padding, block-diag adjacency, grid/BlockSpec setup.
# ----------------------------------------------------------------------------
def _pick_group(n, p_pad, max_g=32):
    """Slabs per grid step G: a divisor of n, capped (block-diag A grows as G^2),
    preferring >= 2 grid steps (megacore sharding) and G*p_pad a multiple of 128
    (MXU-granularity row counts)."""
    divisors = [g for g in range(1, min(n, max_g) + 1) if n % g == 0]
    multi = [g for g in divisors if n // g >= 2] or divisors
    mxu = [g for g in multi if (g * p_pad) % 128 == 0]
    return max(mxu) if mxu else max(multi)


def divided_gcb_forward(x, temporal_mask, params, a_norm, *, max_group=32):
    del temporal_mask  # only used by pooling='weighted_pool' in the reference
    B, T, P, D = x.shape
    E = params["w1"].shape[1]
    N = B * T
    P_PAD = ((P + 7) // 8) * 8           # sublane-align the joint axis (22 -> 24)
    G = _pick_group(N, P_PAD, max_group)
    GP = G * P_PAD

    # ---- host-side layout prep (cheap XLA ops) ----
    xf = x.reshape(N, P, D).astype(jnp.float32)
    xf = jnp.pad(xf, ((0, 0), (0, P_PAD - P), (0, 0)))
    xf = xf.reshape(N * P_PAD, D).astype(jnp.bfloat16)         # (N*P_PAD, D)

    a_pad = jnp.pad(a_norm.astype(jnp.float32),
                    ((0, P_PAD - P), (0, P_PAD - P)))          # zero pad rows/cols
    a_blk = jnp.kron(jnp.eye(G, dtype=jnp.float32),
                     a_pad).astype(jnp.bfloat16)               # (GP, GP)

    avg = jnp.where(jnp.arange(P_PAD) < P, 1.0 / P, 0.0).astype(jnp.float32)
    pool_mat = jnp.kron(jnp.eye(G, dtype=jnp.float32), avg[None, :])   # (G, GP)

    w1 = params["w1"].astype(jnp.bfloat16)
    w2 = params["w2"].astype(jnp.bfloat16)
    w3 = params["w3"].astype(jnp.bfloat16)
    b1, b2, b3 = params["b1"], params["b2"], params["b3"]      # f32 biases

    const = lambda n: (0, 0)             # constant-index operands: DMA'd once

    out = pl.pallas_call(
        gcb_kernel,
        out_shape=jax.ShapeDtypeStruct((N, E), jnp.float32),
        grid_spec=pltpu.PrefetchScalarGridSpec(
            num_scalar_prefetch=0,
            grid=(N // G,),
            in_specs=[
                pl.BlockSpec((GP, GP), const),             # block-diag adjacency
                pl.BlockSpec((G, GP), const),              # pooling matrix
                pl.BlockSpec((GP, D), lambda n: (n, 0)),   # G (b,t) slabs of x
                pl.BlockSpec((D, E), const),               # W1 (BN-folded)
                pl.BlockSpec((1, E), const),               # b1
                pl.BlockSpec((E, E), const),               # W2
                pl.BlockSpec((1, E), const),               # b2
                pl.BlockSpec((E, E), const),               # W3
                pl.BlockSpec((1, E), const),               # b3
            ],
            out_specs=pl.BlockSpec((G, E), lambda n: (n, 0)),  # lane-dense slab
        ),
        compiler_params=pltpu.CompilerParams(
            dimension_semantics=("parallel",)),   # independent slabs -> megacore-shardable
    )(a_blk, pool_mat, xf, w1, b1, w2, b2, w3, b3)

    return out.reshape(B, T, E)          # 'b t d'


# ----------------------------------------------------------------------------
# Pure-JAX reference (f32) of the same folded-BN residual-GCN forward.
# ----------------------------------------------------------------------------
def reference_forward(x, params, a_norm):
    B, T, P, D = x.shape
    xr = x.reshape(B * T, P, D).astype(jnp.float32)
    A = a_norm.astype(jnp.float32)
    h = jnp.einsum('pq,nqd->npd', A, xr)
    h = jnp.maximum(h @ params["w1"] + params["b1"], 0.0)
    r = jnp.einsum('pq,nqd->npd', A, h)
    r = jnp.maximum(r @ params["w2"] + params["b2"], 0.0)
    r = jnp.einsum('pq,nqd->npd', A, r)
    r = jnp.maximum(r @ params["w3"] + params["b3"], 0.0)
    h = h + r
    return h.mean(axis=1).reshape(B, T, -1)


# ----------------------------------------------------------------------------
# Deterministic parameter / adjacency construction (synthetic, no checkpoint).
# ----------------------------------------------------------------------------
def build_adjacency(num_joints):
    idx = jnp.arange(num_joints)
    adj = (jnp.abs(idx[:, None] - idx[None, :]) <= 1)   # chain skeleton + self-loops
    A = adj.astype(jnp.float32)                         # graph.A.max(0) != 0 -> float
    deg = A.sum(axis=1)
    dinv = 1.0 / jnp.sqrt(deg)
    return A * dinv[:, None] * dinv[None, :]            # D^-1/2 A D^-1/2


def _folded_gconv(keys, fan_in, fan_out):
    kw, kb, kg, kbeta, kmu, kvar = keys
    w = jax.random.normal(kw, (fan_in, fan_out), jnp.float32) / jnp.sqrt(fan_in)
    b = 0.01 * jax.random.normal(kb, (fan_out,), jnp.float32)
    gamma = 1.0 + 0.1 * jax.random.normal(kg, (fan_out,), jnp.float32)
    beta = 0.1 * jax.random.normal(kbeta, (fan_out,), jnp.float32)
    mu = 0.05 * jax.random.normal(kmu, (fan_out,), jnp.float32)
    var = 1.0 + jnp.abs(0.1 * jax.random.normal(kvar, (fan_out,), jnp.float32))
    s = gamma / jnp.sqrt(var + 1e-5)          # fold eval-mode BN into conv
    w_f = w * s[None, :]
    b_f = (b - mu) * s + beta
    return w_f, b_f.reshape(1, fan_out)


def init_params(key, in_dim, embed_dims):
    keys = jax.random.split(key, 18)
    w1, b1 = _folded_gconv(keys[0:6], in_dim, embed_dims)
    w2, b2 = _folded_gconv(keys[6:12], embed_dims, embed_dims)
    w3, b3 = _folded_gconv(keys[12:18], embed_dims, embed_dims)
    return {"w1": w1, "b1": b1, "w2": w2, "b2": b2, "w3": w3, "b3": b3}


# ----------------------------------------------------------------------------
if __name__ == "__main__":
    B, T, P, IN_DIM, EMBED = 2, 8, 22, 16, 32     # small, shapes implied by forward

    key = jax.random.PRNGKey(0)
    kx, kp = jax.random.split(key)
    x = jax.random.normal(kx, (B, T, P, IN_DIM), jnp.float32)
    temporal_mask = jnp.ones((B, T), dtype=jnp.bool_)

    params = init_params(kp, IN_DIM, EMBED)
    a_norm = build_adjacency(P)

    fwd = jax.jit(divided_gcb_forward)
    out = fwd(x, temporal_mask, params, a_norm)
    out = jax.block_until_ready(out)
    assert out.shape == (B, T, EMBED), out.shape
    assert out.dtype == jnp.float32

    # correctness vs. f32 pure-JAX reference (loose tolerance: bf16 MXU inputs)
    ref = jax.block_until_ready(reference_forward(x, params, a_norm))
    err = float(jnp.max(jnp.abs(out - ref)))
    scale = float(jnp.max(jnp.abs(ref))) + 1e-6
    assert err / scale < 5e-2, ("pallas/ref mismatch", err, scale)

    print("KERNEL_OK")
</pallas_src>

<mosaic_0001>
module attributes {stable_mosaic.version = 11 : i64} {
  func.func @gcb_kernel(%arg0: i32, %arg1: memref<192x192xbf16, #tpu.memory_space<vmem>>, %arg2: memref<8x192xf32, #tpu.memory_space<vmem>>, %arg3: memref<192x16xbf16, #tpu.memory_space<vmem>>, %arg4: memref<16x32xbf16, #tpu.memory_space<vmem>>, %arg5: memref<1x32xf32, #tpu.memory_space<vmem>>, %arg6: memref<32x32xbf16, #tpu.memory_space<vmem>>, %arg7: memref<1x32xf32, #tpu.memory_space<vmem>>, %arg8: memref<32x32xbf16, #tpu.memory_space<vmem>>, %arg9: memref<1x32xf32, #tpu.memory_space<vmem>>, %arg10: memref<8x32xf32, #tpu.memory_space<vmem>>) attributes {dimension_semantics = [#tpu.dimension_semantics<parallel>], iteration_bounds = array<i64: 2>, scalar_prefetch = 0 : i64, scratch_operands = 0 : i64, tpu.core_type = #tpu.core_type<tc>, window_params = [{pipeline_mode = #tpu.pipeline_mode<synchronous>, transform_indices = @transform_0, window_bounds = array<i64: 192, 192>}, {pipeline_mode = #tpu.pipeline_mode<synchronous>, transform_indices = @transform_1, window_bounds = array<i64: 8, 192>}, {transform_indices = @transform_2, window_bounds = array<i64: 192, 16>}, {pipeline_mode = #tpu.pipeline_mode<synchronous>, transform_indices = @transform_3, window_bounds = array<i64: 16, 32>}, {pipeline_mode = #tpu.pipeline_mode<synchronous>, transform_indices = @transform_4, window_bounds = array<i64: 1, 32>}, {pipeline_mode = #tpu.pipeline_mode<synchronous>, transform_indices = @transform_5, window_bounds = array<i64: 32, 32>}, {pipeline_mode = #tpu.pipeline_mode<synchronous>, transform_indices = @transform_6, window_bounds = array<i64: 1, 32>}, {pipeline_mode = #tpu.pipeline_mode<synchronous>, transform_indices = @transform_7, window_bounds = array<i64: 32, 32>}, {pipeline_mode = #tpu.pipeline_mode<synchronous>, transform_indices = @transform_8, window_bounds = array<i64: 1, 32>}, {transform_indices = @transform_9, window_bounds = array<i64: 8, 32>}]} {
    %c0 = arith.constant 0 : index
    %c0_0 = arith.constant 0 : index
    %0 = vector.load %arg1[%c0, %c0_0] : memref<192x192xbf16, #tpu.memory_space<vmem>>, vector<192x192xbf16>
    %c0_1 = arith.constant 0 : index
    %c0_2 = arith.constant 0 : index
    %1 = vector.load %arg3[%c0_1, %c0_2] : memref<192x16xbf16, #tpu.memory_space<vmem>>, vector<192x16xbf16>
    %cst = arith.constant dense<0.000000e+00> : vector<192x16xf32>
    %2 = tpu.matmul %0, %1, %cst {dimension_numbers = #tpu.dot_dimension_numbers<[1], [0], [0], [1], [0, 0, 1, 1], [], []>} : vector<192x192xbf16>, vector<192x16xbf16>, vector<192x16xf32> -> vector<192x16xf32>
    %3 = arith.truncf %2 : vector<192x16xf32> to vector<192x16xbf16>
    %c0_3 = arith.constant 0 : index
    %c0_4 = arith.constant 0 : index
    %4 = vector.load %arg4[%c0_3, %c0_4] : memref<16x32xbf16, #tpu.memory_space<vmem>>, vector<16x32xbf16>
    %cst_5 = arith.constant dense<0.000000e+00> : vector<192x32xf32>
    %5 = tpu.matmul %3, %4, %cst_5 {dimension_numbers = #tpu.dot_dimension_numbers<[1], [0], [0], [1], [0, 0, 1, 1], [], []>} : vector<192x16xbf16>, vector<16x32xbf16>, vector<192x32xf32> -> vector<192x32xf32>
    %c0_6 = arith.constant 0 : index
    %c0_7 = arith.constant 0 : index
    %6 = vector.load %arg5[%c0_6, %c0_7] : memref<1x32xf32, #tpu.memory_space<vmem>>, vector<1x32xf32>
    %7 = vector.broadcast %6 : vector<1x32xf32> to vector<192x32xf32>
    %8 = arith.addf %5, %7 : vector<192x32xf32>
    %cst_8 = arith.constant 0.000000e+00 : f32
    %9 = vector.broadcast %cst_8 : f32 to vector<192x32xf32>
    %10 = arith.maximumf %8, %9 : vector<192x32xf32>
    %11 = arith.truncf %10 : vector<192x32xf32> to vector<192x32xbf16>
    %cst_9 = arith.constant dense<0.000000e+00> : vector<192x32xf32>
    %12 = tpu.matmul %0, %11, %cst_9 {dimension_numbers = #tpu.dot_dimension_numbers<[1], [0], [0], [1], [0, 0, 1, 1], [], []>} : vector<192x192xbf16>, vector<192x32xbf16>, vector<192x32xf32> -> vector<192x32xf32>
    %13 = arith.truncf %12 : vector<192x32xf32> to vector<192x32xbf16>
    %c0_10 = arith.constant 0 : index
    %c0_11 = arith.constant 0 : index
    %14 = vector.load %arg6[%c0_10, %c0_11] : memref<32x32xbf16, #tpu.memory_space<vmem>>, vector<32x32xbf16>
    %cst_12 = arith.constant dense<0.000000e+00> : vector<192x32xf32>
    %15 = tpu.matmul %13, %14, %cst_12 {dimension_numbers = #tpu.dot_dimension_numbers<[1], [0], [0], [1], [0, 0, 1, 1], [], []>} : vector<192x32xbf16>, vector<32x32xbf16>, vector<192x32xf32> -> vector<192x32xf32>
    %c0_13 = arith.constant 0 : index
    %c0_14 = arith.constant 0 : index
    %16 = vector.load %arg7[%c0_13, %c0_14] : memref<1x32xf32, #tpu.memory_space<vmem>>, vector<1x32xf32>
    %17 = vector.broadcast %16 : vector<1x32xf32> to vector<192x32xf32>
    %18 = arith.addf %15, %17 : vector<192x32xf32>
    %cst_15 = arith.constant 0.000000e+00 : f32
    %19 = vector.broadcast %cst_15 : f32 to vector<192x32xf32>
    %20 = arith.maximumf %18, %19 : vector<192x32xf32>
    %21 = arith.truncf %20 : vector<192x32xf32> to vector<192x32xbf16>
    %cst_16 = arith.constant dense<0.000000e+00> : vector<192x32xf32>
    %22 = tpu.matmul %0, %21, %cst_16 {dimension_numbers = #tpu.dot_dimension_numbers<[1], [0], [0], [1], [0, 0, 1, 1], [], []>} : vector<192x192xbf16>, vector<192x32xbf16>, vector<192x32xf32> -> vector<192x32xf32>
    %23 = arith.truncf %22 : vector<192x32xf32> to vector<192x32xbf16>
    %c0_17 = arith.constant 0 : index
    %c0_18 = arith.constant 0 : index
    %24 = vector.load %arg8[%c0_17, %c0_18] : memref<32x32xbf16, #tpu.memory_space<vmem>>, vector<32x32xbf16>
    %cst_19 = arith.constant dense<0.000000e+00> : vector<192x32xf32>
    %25 = tpu.matmul %23, %24, %cst_19 {dimension_numbers = #tpu.dot_dimension_numbers<[1], [0], [0], [1], [0, 0, 1, 1], [], []>} : vector<192x32xbf16>, vector<32x32xbf16>, vector<192x32xf32> -> vector<192x32xf32>
    %c0_20 = arith.constant 0 : index
    %c0_21 = arith.constant 0 : index
    %26 = vector.load %arg9[%c0_20, %c0_21] : memref<1x32xf32, #tpu.memory_space<vmem>>, vector<1x32xf32>
    %27 = vector.broadcast %26 : vector<1x32xf32> to vector<192x32xf32>
    %28 = arith.addf %25, %27 : vector<192x32xf32>
    %cst_22 = arith.constant 0.000000e+00 : f32
    %29 = vector.broadcast %cst_22 : f32 to vector<192x32xf32>
    %30 = arith.maximumf %28, %29 : vector<192x32xf32>
    %31 = arith.addf %10, %30 : vector<192x32xf32>
    %c0_23 = arith.constant 0 : index
    %c0_24 = arith.constant 0 : index
    %32 = vector.load %arg2[%c0_23, %c0_24] : memref<8x192xf32, #tpu.memory_space<vmem>>, vector<8x192xf32>
    %cst_25 = arith.constant dense<0.000000e+00> : vector<8x32xf32>
    %33 = tpu.matmul %32, %31, %cst_25 {dimension_numbers = #tpu.dot_dimension_numbers<[1], [0], [0], [1], [0, 0, 1, 1], [], []>} : vector<8x192xf32>, vector<192x32xf32>, vector<8x32xf32> -> vector<8x32xf32>
    %c0_26 = arith.constant 0 : index
    %c0_27 = arith.constant 0 : index
    %34 = vector.load %arg10[%c0_26, %c0_27] : memref<8x32xf32, #tpu.memory_space<vmem>>, vector<8x32xf32>
    tpu.vector_store %arg10[%c0_26, %c0_27], %33 {strides = array<i32>} : memref<8x32xf32, #tpu.memory_space<vmem>>, vector<8x32xf32>,
    return
  }
  func.func @transform_0(%arg0: i32) -> (i32, i32) {
    %c0_i32 = arith.constant 0 : i32
    %c0_i32_0 = arith.constant 0 : i32
    %c0_i32_1 = arith.constant 0 : i32
    return %c0_i32, %c0_i32_0 : i32, i32
  }
  func.func @transform_1(%arg0: i32) -> (i32, i32) {
    %c0_i32 = arith.constant 0 : i32
    %c0_i32_0 = arith.constant 0 : i32
    %c0_i32_1 = arith.constant 0 : i32
    return %c0_i32, %c0_i32_0 : i32, i32
  }
  func.func @transform_2(%arg0: i32) -> (i32, i32) {
    %c0_i32 = arith.constant 0 : i32
    %c0_i32_0 = arith.constant 0 : i32
    return %arg0, %c0_i32 : i32, i32
  }
  func.func @transform_3(%arg0: i32) -> (i32, i32) {
    %c0_i32 = arith.constant 0 : i32
    %c0_i32_0 = arith.constant 0 : i32
    %c0_i32_1 = arith.constant 0 : i32
    return %c0_i32, %c0_i32_0 : i32, i32
  }
  func.func @transform_4(%arg0: i32) -> (i32, i32) {
    %c0_i32 = arith.constant 0 : i32
    %c0_i32_0 = arith.constant 0 : i32
    %c0_i32_1 = arith.constant 0 : i32
    return %c0_i32, %c0_i32_0 : i32, i32
  }
  func.func @transform_5(%arg0: i32) -> (i32, i32) {
    %c0_i32 = arith.constant 0 : i32
    %c0_i32_0 = arith.constant 0 : i32
    %c0_i32_1 = arith.constant 0 : i32
    return %c0_i32, %c0_i32_0 : i32, i32
  }
  func.func @transform_6(%arg0: i32) -> (i32, i32) {
    %c0_i32 = arith.constant 0 : i32
    %c0_i32_0 = arith.constant 0 : i32
    %c0_i32_1 = arith.constant 0 : i32
    return %c0_i32, %c0_i32_0 : i32, i32
  }
  func.func @transform_7(%arg0: i32) -> (i32, i32) {
    %c0_i32 = arith.constant 0 : i32
    %c0_i32_0 = arith.constant 0 : i32
    %c0_i32_1 = arith.constant 0 : i32
    return %c0_i32, %c0_i32_0 : i32, i32
  }
  func.func @transform_8(%arg0: i32) -> (i32, i32) {
    %c0_i32 = arith.constant 0 : i32
    %c0_i32_0 = arith.constant 0 : i32
    %c0_i32_1 = arith.constant 0 : i32
    return %c0_i32, %c0_i32_0 : i32, i32
  }
  func.func @transform_9(%arg0: i32) -> (i32, i32) {
    %c0_i32 = arith.constant 0 : i32
    %c0_i32_0 = arith.constant 0 : i32
    return %arg0, %c0_i32 : i32, i32
  }
}

</mosaic_0001>

<bundles_post_ra>
// kernel: divided_gcb_forward.1
= control target key start
LH: loop header
LB: loop body
LE: loop exit
PB: predicated region body
PF: predicated region fallthrough
CT: control target
= control target key end

     0   :  { %14 = vsyncpa [#allocation3], 0  ;;  %s3049_s0 = inlined_call_operand.vmem [shape: bf16[192,192], index: 0, kind: input, shape index: {}]   ;;  %s3050_s1 = inlined_call_operand.vmem [shape: f32[8,192], index: 1, kind: input, shape index: {}]   ;;  %s3051_s2 = inlined_call_operand.vmem [shape: bf16[384,16], index: 2, kind: input, shape index: {}]   ;;  %s3052_s3 = inlined_call_operand.vmem [shape: bf16[16,32], index: 3, kind: input, shape index: {}]   ;;  %s3053_s4 = inlined_call_operand.vmem [shape: f32[1,32], index: 4, kind: input, shape index: {}]   ;;  %s3054_s5 = inlined_call_operand.vmem [shape: bf16[32,32], index: 5, kind: input, shape index: {}]   ;;  %s3055_s6 = inlined_call_operand.vmem [shape: f32[1,32], index: 6, kind: input, shape index: {}]   ;;  %s3056_s7 = inlined_call_operand.vmem [shape: bf16[32,32], index: 7, kind: input, shape index: {}]   ;;  %s3057_s8 = inlined_call_operand.vmem [shape: f32[1,32], index: 8, kind: input, shape index: {}]   ;;  %s3058_s9 = inlined_call_operand.hbm [shape: f32[16,32], index: 9, kind: output, shape index: {}]  }
   0x1   :  { %16 = vsyncpa [#allocation3 + $0x1], 0  ;;  %s2346_s30 = smov 0   ;;  %s2348_s10 = smov 0  }
   0x2   :  { %s2350_s11 = smov 0   ;;  %s2352_s12 = smov 0  }
   0x3 LB: > { %s2367_s13 = sadd.s32 4294967295, %s2291_s12   ;;  %s1849_s14 = sadd.s32 4294967294, %s2291_s12   ;;  %s2291_s12 = sphi %s2352_s12, %s3115_s12   ;;  %s2287_s11 = sphi %s2350_s11, %s3114_s11   ;;  %s2283_s10 = sphi %s2348_s10, %s3113_s10   ;;  %s2279_s30 = sphi %s2346_s30, %s3112_s30  }
   0x4   : > { %s2371_s15 = sadd.s32 1, %s2291_s12   ;;  %s223_s16 = sadd.s32 1, %s2287_s11 }
   0x5   : > { %s220_s17 = ssub.s32 %s2291_s12, %s2371_s15  ;;  %p233_p0 = scmp.ne.s32.totalorder %s2287_s11, %s2283_s10 }
   0x6   : > { %p221_p1 = scmp.eq.s32.totalorder %s220_s17, 0  ;;  %p234_p2 = scmp.eq.s32.totalorder %s2367_s13, 1 }
   0x7   : > { %p239_p3 = scmp.ne.s32.totalorder %s2283_s10, %s2279_s30  ;;  %p240_p4 = scmp.eq.s32.totalorder %s1849_s14, 1 }
   0x8   : > { %s2382_s18 = scalar_select %p221_p1, %s2287_s11, %s223_s16  }
   0x9   : > { %p2384_p5 = por %p234_p2, %p233_p0  ;;  %p2388_p6 = por %p240_p4, %p239_p3 }
   0xa   : > { %p1852_p7 = scmp.ge.s32.totalorder %s2291_s12, 1  ;;  %p291_p8 = scmp.lt.s32.totalorder %s2291_s12, 3 }
   0xc   : > { %p292_p9 = pnand %p1852_p7, %p291_p8 }
   0xe   : > { %295 = sbr.rel (%p292_p9) target bundleno = 1900 (0x76c), region = 56 }
  0x15   : > { %s327_s21 = smul.u32 24, %s2367_s13  ;;  %v2398_v0 = vld [vmem:[%s3049_s0 + $0x4] ss:$8 sps:$4 sm:$0xff]   ;;  %v2293_v1 = vmov 0   ;;  %vm562_vm0 = vcmask 523264   ;;  %vm755_vm1 = vcmask 130048  }
  0x16   : > { %599 = vmatprep.subr.bf16.mxu0 %v2293_v1  ;;  %1891 = vmatprep.mubr.msk.bf16.mxu0 %vm562_vm0, %v2398_v0  ;;  %v2434_v14 = vld [vmem:[%s3049_s0] ss:$8 sps:$4 sm:$0xff]   ;;  %v2439_v15 = vld [vmem:[%s3049_s0 + $0x14] ss:$8 sps:$4 sm:$0xff]   ;;  %v2447_v16 = vld [vmem:[%s3049_s0 + $0x10] ss:$8 sps:$4 sm:$0xff]  }
  0x17   : > { %p328_p10 = scmp.lt.s32.totalorder %s327_s21, 47  ;;  %v2452_v17 = vld [vmem:[%s3049_s0 + $0x24] ss:$8 sps:$4 sm:$0xff]   ;;  %v2460_v18 = vld [vmem:[%s3049_s0 + $0x20] ss:$8 sps:$4 sm:$0xff]   ;;  %vm1121_vm2 = vcmask 261120  }
  0x18   : > { %v2465_v19 = vld [vmem:[%s3049_s0 + $0x34] ss:$8 sps:$4 sm:$0xff]   ;;  %v2473_v20 = vld [vmem:[%s3049_s0 + $0x30] ss:$8 sps:$4 sm:$0xff]   ;;  %v2478_v21 = vld [vmem:[%s3049_s0 + $0x44] ss:$8 sps:$4 sm:$0xff]  }
  0x19   : > { %s3117_s21 = smov (!%p328_p10, %s327_s21), 47  ;;  %v2486_v22 = vld [vmem:[%s3049_s0 + $0x40] ss:$8 sps:$4 sm:$0xff]   ;;  %v2491_v23 = vld [vmem:[%s3049_s0 + $0x54] ss:$8 sps:$4 sm:$0xff]   ;;  %s324_s22 = sand.u32 1, %s2283_s10  }
  0x1a   : > { %s1854_s24 = sshll.u32 %s3117_s21, 2  ;;  %v2499_v24 = vld [vmem:[%s3049_s0 + $0x50] ss:$8 sps:$4 sm:$0xff]   ;;  %v2504_v25 = vld [vmem:[%s3049_s0 + $0x64] ss:$8 sps:$4 sm:$0xff]   ;;  %s1853_s23 = sshll.u32 %s324_s22, 3 }
  0x1b   : > { %s2406_s27 = scalar_lea.vmem %s3051_s2, %s1854_s24  ;;  %v2512_v26 = vld [vmem:[%s3049_s0 + $0x60] ss:$8 sps:$4 sm:$0xff]   ;;  %v2517_v27 = vld [vmem:[%s3049_s0 + $0x74] ss:$8 sps:$4 sm:$0xff]   ;;  %v2525_v28 = vld [vmem:[%s3049_s0 + $0x70] ss:$8 sps:$4 sm:$0xff]  }
  0x1c   : > { %v2176_v2 = vld [vmem:[%s2406_s27] sm:$0xff]   ;;  %v2177_v3 = vld [vmem:[%s2406_s27 + $0x8] sm:$0xff]   ;;  %v2178_v4 = vld [vmem:[%s2406_s27 + $0x10] sm:$0xff]   ;;  %s1973_s24 = sshll.u32 %s2367_s13, 7  ;;  %s326_s25 = scalar_lea.vmem [#allocation2], %s1853_s23 }
  0x1d   : > { %600 = vmatpush1.bf16.msra.mxu0 %v2176_v2  ;;  %v2179_v5 = vld [vmem:[%s2406_s27 + $0x18] sm:$0xff]   ;;  %v2180_v6 = vld [vmem:[%s2406_s27 + $0x20] sm:$0xff]   ;;  %v2181_v7 = vld [vmem:[%s2406_s27 + $0x28] sm:$0xff]   ;;  %s1790_s26 = sshll.u32 %s326_s25, 4  ;;  %s3006_s29 = scalar_lea.hbm %s3058_s9, %s1973_s24  ;;  %s3008_s26 = int_to_ptr.vmem [resolvable:$true] %s1790_s26 }
  0x1e   : > { %601 = vmatprep.subr.bf16.mxu0 %v2293_v1  ;;  %v2182_v8 = vld [vmem:[%s2406_s27 + $0x30] sm:$0xff]   ;;  %v2183_v9 = vld [vmem:[%s2406_s27 + $0x38] sm:$0xff]   ;;  %v2184_v10 = vld [vmem:[%s2406_s27 + $0x40] sm:$0xff]   ;;  %s1777_s14 = scalar_lea.sflag [#allocation3], %s324_s22  ;;  %s2229_s16 = scalar_lea.vmem %s3008_s26, 128 }
  0x1f   : > { %v2185_v11 = vld [vmem:[%s2406_s27 + $0x48] sm:$0xff]   ;;  %v2186_v12 = vld [vmem:[%s2406_s27 + $0x50] sm:$0xff]   ;;  %v2187_v13 = vld [vmem:[%s2406_s27 + $0x58] sm:$0xff]   ;;  %p2230_p11 = scmp.ne.s32.totalorder %s3008_s26, %s2229_s16  ;;  %s2295_s13 = smov [#allocation2]  }
  0x20   : > { %v2530_v29 = vld [vmem:[%s3049_s0 + $0x84] ss:$8 sps:$4 sm:$0xff]   ;;  %v2538_v30 = vld [vmem:[%s3049_s0 + $0x80] ss:$8 sps:$4 sm:$0xff]   ;;  %v2543_v31 = vld [vmem:[%s3049_s0 + $0x94] ss:$8 sps:$4 sm:$0xff]  }
  0x21   : > { %602 = vmatpush1.bf16.msra.mxu0 %v2177_v3  ;;  %v2551_v32 = vld [vmem:[%s3049_s0 + $0x90] ss:$8 sps:$4 sm:$0xff]   ;;  %v2556_v33 = vld [vmem:[%s3049_s0 + $0xa4] ss:$8 sps:$4 sm:$0xff]   ;;  %v2564_v34 = vld [vmem:[%s3049_s0 + $0xa0] ss:$8 sps:$4 sm:$0xff]   ;;  %p2231_p12 = pnand %p2230_p11, %p2384_p5 }
  0x22   : > { %603 = vmatprep.subr.bf16.mxu0 %v2293_v1  ;;  %v2569_v35 = vld [vmem:[%s3049_s0 + $0xb4] ss:$8 sps:$4 sm:$0xff]   ;;  %v2577_v36 = vld [vmem:[%s3049_s0 + $0xb0] ss:$8 sps:$4 sm:$0xff]   ;;  %v2224_v37 = vld [vmem:[%s3052_s3] sm:$0xff]   ;;  %s2233_s17 = sshll.u32 %s2295_s13, 4  ;;  %s2234_s17 = int_to_ptr.vmem [resolvable:$false] %s2233_s17 }
  0x23   : > { %2017 = vmatprep.subr.bf16.mxu1 %v2224_v37  ;;  %p2232_p13 = pneg %p2231_p12  ;;  %s2235_s21 = scalar_lea.vmem %s2234_s17, 256 }
  0x24   : > { %2018 = vmatpush3.bf16.msra.mxu1 %v2224_v37  ;;  %p2236_p0 = scmp.lt.s32.totalorder %s3008_s26, %s2234_s17  ;;  %p2237_p1 = scmp.lt.s32.totalorder %s2235_s21, %s2229_s16 }
  0x25   : > { %604 = vmatpush1.bf16.msra.mxu0 %v2178_v4  ;;  %957 = vmatprep.subr.bf16.mxu1 %v2293_v1 }
  0x26   : > { %605 = vmatprep.subr.bf16.mxu0 %v2293_v1  ;;  %p2238_p2 = por %p2237_p1, %p2236_p0 }
  0x28   : > { %p2239_p3 = pnand %p2238_p2, %p2232_p13 }
  0x29   : > { %606 = vmatpush1.bf16.msra.mxu0 %v2179_v5 }
  0x2a   : > { %607 = vmatprep.subr.bf16.mxu0 %v2293_v1 }
  0x2d   : > { %608 = vmatpush1.bf16.msra.mxu0 %v2180_v6 }
  0x2e   : > { %609 = vmatprep.subr.bf16.mxu0 %v2293_v1 }
  0x31   : > { %610 = vmatpush1.bf16.msra.mxu0 %v2181_v7 }
  0x32   : > { %611 = vmatprep.subr.bf16.mxu0 %v2293_v1 }
  0x35   : > { %612 = vmatpush1.bf16.msra.mxu0 %v2182_v8 }
  0x36   : > { %613 = vmatprep.subr.bf16.mxu0 %v2293_v1 }
  0x39   : > { %614 = vmatpush1.bf16.msra.mxu0 %v2183_v9 }
  0x3a   : > { %615 = vmatprep.subr.bf16.mxu0 %v2293_v1 }
  0x3d   : > { %616 = vmatpush1.bf16.msra.mxu0 %v2184_v10 }
  0x3e   : > { %617 = vmatprep.subr.bf16.mxu0 %v2293_v1 }
  0x41   : > { %618 = vmatpush1.bf16.msra.mxu0 %v2185_v11 }
  0x42   : > { %619 = vmatprep.subr.bf16.mxu0 %v2293_v1 }
  0x45   : > { %620 = vmatpush1.bf16.msra.mxu0 %v2186_v12 }
  0x46   : > { %621 = vmatprep.subr.bf16.mxu0 %v2293_v1 }
  0x49   : > { %622 = vmatpush1.bf16.msra.mxu0 %v2187_v13 }
  0x4c   : > { %632 = vmatmul.mubr.bf16.vlgmr.msra.gmra.mrb[0].mxu0 %v2434_v14 }
  0x4d   : > { %1892 = vmatprep.mubr.msk.bf16.mxu0 %vm562_vm0, %v2439_v15 }
  0x54   : > { %640 = vmatmul.mubr.bf16.gmra.mrb[4].mxu0 %v2447_v16 }
  0x55   : > { %1893 = vmatprep.mubr.msk.bf16.mxu0 %vm562_vm0, %v2452_v17 }
  0x5c   : > { %648 = vmatmul.mubr.bf16.gmra.mrb[8].mxu0 %v2460_v18 }
  0x5d   : > { %1894 = vmatprep.mubr.msk.bf16.mxu0 %vm562_vm0, %v2465_v19 }
  0x64   : > { %656 = vmatmul.mubr.bf16.gmra.mrb[12].mxu0 %v2473_v20 }
  0x65   : > { %1895 = vmatprep.mubr.msk.bf16.mxu0 %vm562_vm0, %v2478_v21 }
  0x6c   : > { %664 = vmatmul.mubr.bf16.gmra.mrb[16].mxu0 %v2486_v22 }
  0x6d   : > { %1896 = vmatprep.mubr.msk.bf16.mxu0 %vm562_vm0, %v2491_v23 }
  0x74   : > { %672 = vmatmul.mubr.bf16.gmra.mrb[20].mxu0 %v2499_v24 }
  0x75   : > { %1897 = vmatprep.mubr.msk.bf16.mxu0 %vm562_vm0, %v2504_v25 }
  0x7c   : > { %680 = vmatmul.mubr.bf16.gmra.mrb[24].mxu0 %v2512_v26 }
  0x7d   : > { %1898 = vmatprep.mubr.msk.bf16.mxu0 %vm562_vm0, %v2517_v27 }
  0x84   : > { %688 = vmatmul.mubr.bf16.gmra.mrb[28].mxu0 %v2525_v28 }
  0x85   : > { %1899 = vmatprep.mubr.msk.bf16.mxu0 %vm562_vm0, %v2530_v29 }
  0x8c   : > { %696 = vmatmul.mubr.bf16.gmra.mrb[32].mxu0 %v2538_v30 }
  0x8d   : > { %1900 = vmatprep.mubr.msk.bf16.mxu0 %vm562_vm0, %v2543_v31 }
  0x94   : > { %704 = vmatmul.mubr.bf16.gmra.mrb[36].mxu0 %v2551_v32 }
  0x95   : > { %1901 = vmatprep.mubr.msk.bf16.mxu0 %vm562_vm0, %v2556_v33 }
  0x9c   : > { %712 = vmatmul.mubr.bf16.gmra.mrb[40].mxu0 %v2564_v34 }
  0x9d   : > { %1902 = vmatprep.mubr.msk.bf16.mxu0 %vm562_vm0, %v2569_v35 }
  0xa4   : > { %720 = vmatmul.mubr.bf16.gmra.mrb[44].mxu0 %v2577_v36 }
 0x11f   : > { %v633_v38 = vpop.f32.mrb[0].mxu0 }
 0x120   : > { %v635_v39 = vpop.f32.mrb[1].mxu0 }
 0x121   : > { %v636_v40 = vpop.f32.mrb[2].mxu0 }
 0x122   : > { %v728_v41 = vpack.c.bf16 %v636_v40, %v633_v38  ;;  %v638_v42 = vpop.f32.mrb[3].mxu0 }
 0x124   : > { %2019 = vmatprep.mubr.msk.bf16.mxu1 %vm755_vm1, %v728_v41 }
 0x127   : > { %v641_v43 = vpop.f32.mrb[4].mxu0 }
 0x128   : > { %v643_v44 = vpop.f32.mrb[5].mxu0 }
 0x129   : > { %v644_v45 = vpop.f32.mrb[6].mxu0 }
 0x12a   : > { %v729_v46 = vpack.c.bf16 %v644_v45, %v641_v43  ;;  %v646_v47 = vpop.f32.mrb[7].mxu0 }
 0x12c   : > { %2020 = vmatmul.mubr.msk.bf16.vlgmr.msra.gmra.mrb[0].mxu1 %vm755_vm1, %v729_v46 }
 0x12f   : > { %v649_v48 = vpop.f32.mrb[8].mxu0 }
 0x130   : > { %v651_v49 = vpop.f32.mrb[9].mxu0 }
 0x131   : > { %v652_v50 = vpop.f32.mrb[10].mxu0 }
 0x132   : > { %v730_v51 = vpack.c.bf16 %v652_v50, %v649_v48  ;;  %v654_v52 = vpop.f32.mrb[11].mxu0 }
 0x134   : > { %2023 = vmatprep.mubr.msk.bf16.mxu1 %vm755_vm1, %v730_v51 }
 0x137   : > { %v657_v53 = vpop.f32.mrb[12].mxu0 }
 0x138   : > { %v659_v54 = vpop.f32.mrb[13].mxu0 }
 0x139   : > { %v660_v55 = vpop.f32.mrb[14].mxu0 }
 0x13a   : > { %v731_v56 = vpack.c.bf16 %v660_v55, %v657_v53  ;;  %v662_v57 = vpop.f32.mrb[15].mxu0 }
 0x13c   : > { %2024 = vmatmul.mubr.msk.bf16.gmra.mrb[4].mxu1 %vm755_vm1, %v731_v56 }
 0x13f   : > { %v665_v58 = vpop.f32.mrb[16].mxu0 }
 0x140   : > { %v667_v59 = vpop.f32.mrb[17].mxu0 }
 0x141   : > { %v668_v60 = vpop.f32.mrb[18].mxu0  ;;  %v2601_v59 = vld [vmem:[%s3053_s4] ss:$0 sm:$0xff] }
 0x142   : > { %v732_v61 = vpack.c.bf16 %v668_v60, %v665_v58  ;;  %v670_v62 = vpop.f32.mrb[19].mxu0 }
 0x144   : > { %2027 = vmatprep.mubr.msk.bf16.mxu1 %vm755_vm1, %v732_v61 }
 0x147   : > { %v673_v63 = vpop.f32.mrb[20].mxu0 }
 0x148   : > { %v675_v2 = vpop.f32.mrb[21].mxu0 }
 0x149   : > { %v676_v3 = vpop.f32.mrb[22].mxu0 }
 0x14a   : > { %v733_v4 = vpack.c.bf16 %v676_v3, %v673_v63  ;;  %v678_v5 = vpop.f32.mrb[23].mxu0 }
 0x14c   : > { %2028 = vmatmul.mubr.msk.bf16.gmra.mrb[8].mxu1 %vm755_vm1, %v733_v4 }
 0x14f   : > { %v681_v6 = vpop.f32.mrb[24].mxu0 }
 0x150   : > { %v683_v7 = vpop.f32.mrb[25].mxu0 }
 0x151   : > { %v684_v8 = vpop.f32.mrb[26].mxu0 }
 0x152   : > { %v734_v9 = vpack.c.bf16 %v684_v8, %v681_v6  ;;  %v686_v10 = vpop.f32.mrb[27].mxu0 }
 0x154   : > { %2031 = vmatprep.mubr.msk.bf16.mxu1 %vm755_vm1, %v734_v9 }
 0x157   : > { %v689_v11 = vpop.f32.mrb[28].mxu0 }
 0x158   : > { %v691_v12 = vpop.f32.mrb[29].mxu0 }
 0x159   : > { %v692_v13 = vpop.f32.mrb[30].mxu0 }
 0x15a   : > { %v735_v37 = vpack.c.bf16 %v692_v13, %v689_v11  ;;  %v694_v38 = vpop.f32.mrb[31].mxu0 }
 0x15c   : > { %2032 = vmatmul.mubr.msk.bf16.gmra.mrb[12].mxu1 %vm755_vm1, %v735_v37 }
 0x15f   : > { %v697_v39 = vpop.f32.mrb[32].mxu0 }
 0x160   : > { %v699_v40 = vpop.f32.mrb[33].mxu0 }
 0x161   : > { %v700_v41 = vpop.f32.mrb[34].mxu0 }
 0x162   : > { %v736_v42 = vpack.c.bf16 %v700_v41, %v697_v39  ;;  %v702_v43 = vpop.f32.mrb[35].mxu0 }
 0x164   : > { %2035 = vmatprep.mubr.msk.bf16.mxu1 %vm755_vm1, %v736_v42 }
 0x167   : > { %v705_v44 = vpop.f32.mrb[36].mxu0 }
 0x168   : > { %v707_v45 = vpop.f32.mrb[37].mxu0 }
 0x169   : > { %v708_v46 = vpop.f32.mrb[38].mxu0 }
 0x16a   : > { %v737_v47 = vpack.c.bf16 %v708_v46, %v705_v44  ;;  %v710_v48 = vpop.f32.mrb[39].mxu0 }
 0x16c   : > { %2036 = vmatmul.mubr.msk.bf16.gmra.mrb[16].mxu1 %vm755_vm1, %v737_v47 }
 0x16f   : > { %v713_v49 = vpop.f32.mrb[40].mxu0 }
 0x170   : > { %v715_v50 = vpop.f32.mrb[41].mxu0 }
 0x171   : > { %v716_v51 = vpop.f32.mrb[42].mxu0 }
 0x172   : > { %v738_v52 = vpack.c.bf16 %v716_v51, %v713_v49  ;;  %v718_v53 = vpop.f32.mrb[43].mxu0 }
 0x174   : > { %2039 = vmatprep.mubr.msk.bf16.mxu1 %vm755_vm1, %v738_v52 }
 0x177   : > { %v721_v54 = vpop.f32.mrb[44].mxu0 }
 0x178   : > { %v723_v55 = vpop.f32.mrb[45].mxu0 }
 0x179   : > { %v724_v56 = vpop.f32.mrb[46].mxu0 }
 0x17a   : > { %v739_v57 = vpack.c.bf16 %v724_v56, %v721_v54  ;;  %v726_v58 = vpop.f32.mrb[47].mxu0 }
 0x17c   : > { %2040 = vmatmul.mubr.msk.bf16.gmra.mrb[20].mxu1 %vm755_vm1, %v739_v57 }
 0x17d   : > { %1917 = vmatprep.mubr.msk.bf16.mxu1 %vm562_vm0, %v2398_v0 }
 0x1ff   : > { %v2021_v60 = vpop.f32.mrb[0].mxu1 }
 0x200   : > { %v826_v61 = vpop.f32.mrb[1].mxu1  ;;  %v2613_v5 = vadd.f32 %v2021_v60, %v2601_v59 }
 0x201   : > { %v2604_v62 = vadd.f32 %v2601_v59, %v826_v61  ;;  %v2022_v63 = vpop.f32.mrb[2].mxu1 }
 0x202   : > { %v829_v2 = vpop.f32.mrb[3].mxu1  ;;  %v2607_v3 = vadd.f32 %v2022_v63, %v2601_v59  ;;  %v3082_v10 = vmax.f32 %v2613_v5, 0.0 }
 0x203   : > { %v2610_v4 = vadd.f32 %v2601_v59, %v829_v2  ;;  %v3080_v6 = vmax.f32 %v2604_v62, 0.0 }
 0x204   : > { %v3081_v8 = vmax.f32 %v2607_v3, 0.0 }
 0x205   : > { %v3079_v7 = vmax.f32 %v2610_v4, 0.0 }
 0x206   : > { %v946_v11 = vpack.c.bf16 %v3081_v8, %v3082_v10 }
 0x207   : > { %v945_v9 = vpack.c.bf16 %v3079_v7, %v3080_v6 }
 0x209   : > { %958 = vmatpush1.bf16.msra.mxu1 %v945_v9 }
 0x20a   : > { %959 = vmatprep.subr.bf16.mxu1 %v2293_v1 }
 0x20d   : > { %960 = vmatpush1.bf16.msra.mxu1 %v946_v11 }
 0x20e   : > { %961 = vmatprep.subr.bf16.mxu1 %v2293_v1 }
 0x20f   : > { %v2025_v12 = vpop.f32.mrb[4].mxu1 }
 0x210   : > { %v842_v13 = vpop.f32.mrb[5].mxu1  ;;  %v2639_v42 = vadd.f32 %v2025_v12, %v2601_v59 }
 0x211   : > { %v2630_v37 = vadd.f32 %v2601_v59, %v842_v13  ;;  %v2026_v38 = vpop.f32.mrb[6].mxu1 }
 0x212   : > { %v845_v39 = vpop.f32.mrb[7].mxu1  ;;  %v2633_v40 = vadd.f32 %v2026_v38, %v2601_v59  ;;  %v3078_v47 = vmax.f32 %v2639_v42, 0.0 }
 0x213   : > { %v2636_v41 = vadd.f32 %v2601_v59, %v845_v39  ;;  %v3076_v43 = vmax.f32 %v2630_v37, 0.0 }
 0x214   : > { %v3077_v45 = vmax.f32 %v2633_v40, 0.0 }
 0x215   : > { %v3069_v44 = vmax.f32 %v2636_v41, 0.0 }
 0x216   : > { %v948_v48 = vpack.c.bf16 %v3077_v45, %v3078_v47 }
 0x217   : > { %v947_v46 = vpack.c.bf16 %v3069_v44, %v3076_v43 }
 0x219   : > { %962 = vmatpush1.bf16.msra.mxu1 %v947_v46 }
 0x21a   : > { %963 = vmatprep.subr.bf16.mxu1 %v2293_v1 }
 0x21d   : > { %964 = vmatpush1.bf16.msra.mxu1 %v948_v48 }
 0x21e   : > { %965 = vmatprep.subr.bf16.mxu1 %v2293_v1 }
 0x21f   : > { %v2029_v49 = vpop.f32.mrb[8].mxu1 }
 0x220   : > { %v858_v50 = vpop.f32.mrb[9].mxu1  ;;  %v2665_v56 = vadd.f32 %v2029_v49, %v2601_v59 }
 0x221   : > { %v2656_v51 = vadd.f32 %v2601_v59, %v858_v50  ;;  %v2030_v52 = vpop.f32.mrb[10].mxu1 }
 0x222   : > { %v861_v53 = vpop.f32.mrb[11].mxu1  ;;  %v2659_v54 = vadd.f32 %v2030_v52, %v2601_v59  ;;  %v3066_v63 = vmax.f32 %v2665_v56, 0.0 }
 0x223   : > { %v2662_v55 = vadd.f32 %v2601_v59, %v861_v53  ;;  %v3062_v57 = vmax.f32 %v2656_v51, 0.0 }
 0x224   : > { %v3065_v60 = vmax.f32 %v2659_v54, 0.0 }
 0x225   : > { %v3061_v58 = vmax.f32 %v2662_v55, 0.0 }
 0x226   : > { %v950_v2 = vpack.c.bf16 %v3065_v60, %v3066_v63 }
 0x227   : > { %v949_v61 = vpack.c.bf16 %v3061_v58, %v3062_v57 }
 0x229   : > { %966 = vmatpush1.bf16.msra.mxu1 %v949_v61  ;;  %v2225_v61 = vld [vmem:[%s3054_s5] sm:$0xff]  }
 0x22a   : > { %967 = vmatprep.subr.bf16.mxu1 %v2293_v1  ;;  %2043 = vmatprep.subr.bf16.mxu0 %v2225_v61 }
 0x22b   : > { %2044 = vmatpush3.bf16.msra.mxu0 %v2225_v61 }
 0x22d   : > { %968 = vmatpush1.bf16.msra.mxu1 %v950_v2 }
 0x22e   : > { %969 = vmatprep.subr.bf16.mxu1 %v2293_v1 }
 0x22f   : > { %v2033_v9 = vpop.f32.mrb[12].mxu1 }
 0x230   : > { %v874_v11 = vpop.f32.mrb[13].mxu1  ;;  %v2691_v48 = vadd.f32 %v2033_v9, %v2601_v59 }
 0x231   : > { %v2682_v12 = vadd.f32 %v2601_v59, %v874_v11  ;;  %v2034_v13 = vpop.f32.mrb[14].mxu1 }
 0x232   : > { %v877_v38 = vpop.f32.mrb[15].mxu1  ;;  %v2685_v39 = vadd.f32 %v2034_v13, %v2601_v59  ;;  %v3064_v2 = vmax.f32 %v2691_v48, 0.0 }
 0x233   : > { %v2688_v46 = vadd.f32 %v2601_v59, %v877_v38  ;;  %v3060_v49 = vmax.f32 %v2682_v12, 0.0 }
 0x234   : > { %v3063_v52 = vmax.f32 %v2685_v39, 0.0 }
 0x235   : > { %v3059_v50 = vmax.f32 %v2688_v46, 0.0 }
 0x236   : > { %v952_v9 = vpack.c.bf16 %v3063_v52, %v3064_v2 }
 0x237   : > { %v951_v53 = vpack.c.bf16 %v3059_v50, %v3060_v49 }
 0x239   : > { %970 = vmatpush1.bf16.msra.mxu1 %v951_v53 }
 0x23a   : > { %971 = vmatprep.subr.bf16.mxu1 %v2293_v1 }
 0x23d   : > { %972 = vmatpush1.bf16.msra.mxu1 %v952_v9 }
 0x23e   : > { %973 = vmatprep.subr.bf16.mxu1 %v2293_v1 }
 0x23f   : > { %v2037_v11 = vpop.f32.mrb[16].mxu1 }
 0x240   : > { %v890_v13 = vpop.f32.mrb[17].mxu1  ;;  %v2720_v57 = vadd.f32 %v2037_v11, %v2601_v59 }
 0x241   : > { %v2711_v38 = vadd.f32 %v2601_v59, %v890_v13  ;;  %v2038_v50 = vpop.f32.mrb[18].mxu1 }
 0x242   : > { %v893_v49 = vpop.f32.mrb[19].mxu1  ;;  %v2714_v53 = vadd.f32 %v2038_v50, %v2601_v59  ;;  %v3071_v50 = vmax.f32 %v2720_v57, 0.0 }
 0x243   : > { %v2717_v58 = vadd.f32 %v2601_v59, %v893_v49  ;;  %v3068_v61 = vmax.f32 %v2711_v38, 0.0 }
 0x244   : > { %v3070_v52 = vmax.f32 %v2714_v53, 0.0 }
 0x245   : > { %v3067_v9 = vmax.f32 %v2717_v58, 0.0 }
 0x246   : > { %v954_v49 = vpack.c.bf16 %v3070_v52, %v3071_v50 }
 0x247   : > { %v953_v13 = vpack.c.bf16 %v3067_v9, %v3068_v61 }
 0x249   : > { %974 = vmatpush1.bf16.msra.mxu1 %v953_v13 }
 0x24a   : > { %975 = vmatprep.subr.bf16.mxu1 %v2293_v1 }
 0x24d   : > { %976 = vmatpush1.bf16.msra.mxu1 %v954_v49 }
 0x24e   : > { %977 = vmatprep.subr.bf16.mxu1 %v2293_v1 }
 0x24f   : > { %v2041_v11 = vpop.f32.mrb[20].mxu1 }
 0x250   : > { %v906_v2 = vpop.f32.mrb[21].mxu1  ;;  %v2746_v44 = vadd.f32 %v2041_v11, %v2601_v59 }
 0x251   : > { %v2737_v60 = vadd.f32 %v2601_v59, %v906_v2  ;;  %v2042_v63 = vpop.f32.mrb[22].mxu1 }
 0x252   : > { %v909_v9 = vpop.f32.mrb[23].mxu1  ;;  %v2740_v61 = vadd.f32 %v2042_v63, %v2601_v59  ;;  %v3075_v63 = vmax.f32 %v2746_v44, 0.0 }
 0x253   : > { %v2743_v13 = vadd.f32 %v2601_v59, %v909_v9  ;;  %v3073_v49 = vmax.f32 %v2737_v60, 0.0  ;;  %v2226_v9 = vld [vmem:[%s3054_s5 + $0x8] sm:$0xff]  }
 0x254   : > { %v3074_v50 = vmax.f32 %v2740_v61, 0.0  ;;  %2045 = vmatprep.subr.bf16.mxu0 %v2226_v9 }
 0x255   : > { %3086 = vst [vmem:[#allocation5_spill] sm:$0xff] %v2743_v13  ;;  %v3072_v52 = vmax.f32 %v2743_v13, 0.0  ;;  %2046 = vmatpush3.bf16.msra.mxu0 %v2226_v9 }
 0x256   : > { %v956_v59 = vpack.c.bf16 %v3074_v50, %v3075_v63 }
 0x257   : > { %v955_v2 = vpack.c.bf16 %v3072_v52, %v3073_v49 }
 0x259   : > { %978 = vmatpush1.bf16.msra.mxu1 %v955_v2 }
 0x25a   : > { %979 = vmatprep.subr.bf16.mxu1 %v2293_v1 }
 0x25d   : > { %980 = vmatpush1.bf16.msra.mxu1 %v956_v59 }
 0x25e   : > { %1323 = vmatprep.subr.bf16.mxu1 %v2293_v1 }
 0x260   : > { %990 = vmatmul.mubr.bf16.vlgmr.msra.gmra.mrb[24].mxu1 %v2434_v14 }
 0x261   : > { %1918 = vmatprep.mubr.msk.bf16.mxu1 %vm562_vm0, %v2439_v15 }
 0x268   : > { %998 = vmatmul.mubr.bf16.gmra.mrb[28].mxu1 %v2447_v16 }
 0x269   : > { %1919 = vmatprep.mubr.msk.bf16.mxu1 %vm562_vm0, %v2452_v17 }
 0x270   : > { %1006 = vmatmul.mubr.bf16.gmra.mrb[32].mxu1 %v2460_v18 }
 0x271   : > { %1920 = vmatprep.mubr.msk.bf16.mxu1 %vm562_vm0, %v2465_v19 }
 0x278   : > { %1014 = vmatmul.mubr.bf16.gmra.mrb[36].mxu1 %v2473_v20 }
 0x279   : > { %1921 = vmatprep.mubr.msk.bf16.mxu1 %vm562_vm0, %v2478_v21 }
 0x280   : > { %1022 = vmatmul.mubr.bf16.gmra.mrb[40].mxu1 %v2486_v22 }
 0x281   : > { %1922 = vmatprep.mubr.msk.bf16.mxu1 %vm562_vm0, %v2491_v23 }
 0x288   : > { %1030 = vmatmul.mubr.bf16.gmra.mrb[44].mxu1 %v2499_v24 }
 0x289   : > { %1923 = vmatprep.mubr.msk.bf16.mxu1 %vm562_vm0, %v2504_v25 }
 0x290   : > { %1038 = vmatmul.mubr.bf16.gmra.mrb[48].mxu1 %v2512_v26 }
 0x291   : > { %1924 = vmatprep.mubr.msk.bf16.mxu1 %vm562_vm0, %v2517_v27 }
 0x298   : > { %1046 = vmatmul.mubr.bf16.gmra.mrb[52].mxu1 %v2525_v28 }
 0x299   : > { %1925 = vmatprep.mubr.msk.bf16.mxu1 %vm562_vm0, %v2530_v29 }
 0x2a0   : > { %1054 = vmatmul.mubr.bf16.gmra.mrb[56].mxu1 %v2538_v30 }
 0x2a1   : > { %1926 = vmatprep.mubr.msk.bf16.mxu1 %vm562_vm0, %v2543_v31 }
 0x2a8   : > { %1062 = vmatmul.mubr.bf16.gmra.mrb[60].mxu1 %v2551_v32 }
 0x2a9   : > { %1927 = vmatprep.mubr.msk.bf16.mxu1 %vm562_vm0, %v2556_v33 }
 0x2b0   : > { %1070 = vmatmul.mubr.bf16.gmra.mrb[64].mxu1 %v2564_v34 }
 0x2b1   : > { %1928 = vmatprep.mubr.msk.bf16.mxu1 %vm562_vm0, %v2569_v35 }
 0x2b8   : > { %1078 = vmatmul.mubr.bf16.gmra.mrb[68].mxu1 %v2577_v36 }
 0x2b9   : > { %1944 = vmatprep.mubr.msk.bf16.mxu1 %vm562_vm0, %v2398_v0 }
 0x333   : > { %v991_v11 = vpop.f32.mrb[24].mxu1 }
 0x334   : > { %v993_v2 = vpop.f32.mrb[25].mxu1 }
 0x335   : > { %v994_v59 = vpop.f32.mrb[26].mxu1 }
 0x336   : > { %v1086_v52 = vpack.c.bf16 %v994_v59, %v991_v11  ;;  %v996_v49 = vpop.f32.mrb[27].mxu1 }
 0x338   : > { %2047 = vmatprep.mubr.msk.bf16.mxu0 %vm1121_vm2, %v1086_v52 }
 0x33b   : > { %v999_v50 = vpop.f32.mrb[28].mxu1 }
 0x33c   : > { %v1001_v63 = vpop.f32.mrb[29].mxu1 }
 0x33d   : > { %v1002_v43 = vpop.f32.mrb[30].mxu1 }
 0x33e   : > { %v1087_v45 = vpack.c.bf16 %v1002_v43, %v999_v50  ;;  %v1004_v47 = vpop.f32.mrb[31].mxu1 }
 0x340   : > { %2048 = vmatmul.mubr.msk.bf16.vlgmr.msra.gmra.mrb[48].mxu0 %vm1121_vm2, %v1087_v45 }
 0x343   : > { %v1007_v0 = vpop.f32.mrb[32].mxu1 }
 0x344   : > { %v1009_v7 = vpop.f32.mrb[33].mxu1 }
 0x345   : > { %v1010_v6 = vpop.f32.mrb[34].mxu1 }
 0x346   : > { %v1088_v8 = vpack.c.bf16 %v1010_v6, %v1007_v0  ;;  %v1012_v9 = vpop.f32.mrb[35].mxu1 }
 0x348   : > { %2051 = vmatprep.mubr.msk.bf16.mxu0 %vm1121_vm2, %v1088_v8 }
 0x34b   : > { %v1015_v2 = vpop.f32.mrb[36].mxu1 }
 0x34c   : > { %v1017_v10 = vpop.f32.mrb[37].mxu1 }
 0x34d   : > { %v1018_v11 = vpop.f32.mrb[38].mxu1 }
 0x34e   : > { %v1089_v49 = vpack.c.bf16 %v1018_v11, %v1015_v2  ;;  %v1020_v59 = vpop.f32.mrb[39].mxu1 }
 0x350   : > { %2052 = vmatmul.mubr.msk.bf16.gmra.mrb[52].mxu0 %vm1121_vm2, %v1089_v49 }
 0x353   : > { %v1023_v52 = vpop.f32.mrb[40].mxu1 }
 0x354   : > { %v1025_v63 = vpop.f32.mrb[41].mxu1 }
 0x355   : > { %v1026_v43 = vpop.f32.mrb[42].mxu1 }
 0x356   : > { %v1090_v47 = vpack.c.bf16 %v1026_v43, %v1023_v52  ;;  %v1028_v50 = vpop.f32.mrb[43].mxu1 }
 0x358   : > { %2055 = vmatprep.mubr.msk.bf16.mxu0 %vm1121_vm2, %v1090_v47 }
 0x35b   : > { %v1031_v7 = vpop.f32.mrb[44].mxu1 }
 0x35c   : > { %v1033_v45 = vpop.f32.mrb[45].mxu1 }
 0x35d   : > { %v1034_v6 = vpop.f32.mrb[46].mxu1 }
 0x35e   : > { %v1091_v0 = vpack.c.bf16 %v1034_v6, %v1031_v7  ;;  %v1036_v9 = vpop.f32.mrb[47].mxu1 }
 0x360   : > { %2056 = vmatmul.mubr.msk.bf16.gmra.mrb[56].mxu0 %vm1121_vm2, %v1091_v0 }
 0x363   : > { %v1039_v8 = vpop.f32.mrb[48].mxu1 }
 0x364   : > { %v1041_v10 = vpop.f32.mrb[49].mxu1 }
 0x365   : > { %v1042_v2 = vpop.f32.mrb[50].mxu1 }
 0x366   : > { %v1092_v11 = vpack.c.bf16 %v1042_v2, %v1039_v8  ;;  %v1044_v59 = vpop.f32.mrb[51].mxu1 }
 0x368   : > { %2059 = vmatprep.mubr.msk.bf16.mxu0 %vm1121_vm2, %v1092_v11 }
 0x36b   : > { %v1047_v49 = vpop.f32.mrb[52].mxu1 }
 0x36c   : > { %v1049_v63 = vpop.f32.mrb[53].mxu1 }
 0x36d   : > { %v1050_v52 = vpop.f32.mrb[54].mxu1 }
 0x36e   : > { %v1093_v43 = vpack.c.bf16 %v1050_v52, %v1047_v49  ;;  %v1052_v50 = vpop.f32.mrb[55].mxu1 }
 0x370   : > { %2060 = vmatmul.mubr.msk.bf16.gmra.mrb[60].mxu0 %vm1121_vm2, %v1093_v43 }
 0x373   : > { %v1055_v47 = vpop.f32.mrb[56].mxu1 }
 0x374   : > { %v1057_v45 = vpop.f32.mrb[57].mxu1 }
 0x375   : > { %v1058_v7 = vpop.f32.mrb[58].mxu1 }
 0x376   : > { %v1094_v6 = vpack.c.bf16 %v1058_v7, %v1055_v47  ;;  %v1060_v9 = vpop.f32.mrb[59].mxu1 }
 0x378   : > { %2063 = vmatprep.mubr.msk.bf16.mxu0 %vm1121_vm2, %v1094_v6  ;;  %v2816_v6 = vld [vmem:[%s3055_s6] ss:$0 sm:$0xff] }
 0x37b   : > { %v1063_v0 = vpop.f32.mrb[60].mxu1 }
 0x37c   : > { %v1065_v10 = vpop.f32.mrb[61].mxu1 }
 0x37d   : > { %v1066_v8 = vpop.f32.mrb[62].mxu1 }
 0x37e   : > { %v1095_v2 = vpack.c.bf16 %v1066_v8, %v1063_v0  ;;  %v1068_v59 = vpop.f32.mrb[63].mxu1 }
 0x380   : > { %2064 = vmatmul.mubr.msk.bf16.gmra.mrb[64].mxu0 %vm1121_vm2, %v1095_v2 }
 0x383   : > { %v1071_v11 = vpop.f32.mrb[64].mxu1 }
 0x384   : > { %v1073_v63 = vpop.f32.mrb[65].mxu1 }
 0x385   : > { %v1074_v49 = vpop.f32.mrb[66].mxu1 }
 0x386   : > { %v1096_v52 = vpack.c.bf16 %v1074_v49, %v1071_v11  ;;  %v1076_v50 = vpop.f32.mrb[67].mxu1 }
 0x388   : > { %2067 = vmatprep.mubr.msk.bf16.mxu0 %vm1121_vm2, %v1096_v52 }
 0x38b   : > { %v1079_v43 = vpop.f32.mrb[68].mxu1 }
 0x38c   : > { %v1081_v45 = vpop.f32.mrb[69].mxu1 }
 0x38d   : > { %v1082_v47 = vpop.f32.mrb[70].mxu1 }
 0x38e   : > { %v1097_v7 = vpack.c.bf16 %v1082_v47, %v1079_v43  ;;  %v1084_v9 = vpop.f32.mrb[71].mxu1 }
 0x390   : > { %2068 = vmatmul.mubr.msk.bf16.gmra.mrb[68].mxu0 %vm1121_vm2, %v1097_v7 }
 0x413   : > { %v2049_v0 = vpop.f32.mrb[48].mxu0 }
 0x414   : > { %v1201_v10 = vadd.f32 %v2049_v0, %v2816_v6  ;;  %v1192_v8 = vpop.f32.mrb[49].mxu0 }
 0x415   : > { %v1193_v2 = vadd.f32 %v2816_v6, %v1192_v8  ;;  %v2050_v59 = vpop.f32.mrb[50].mxu0 }
 0x416   : > { %v1204_v11 = vadd.f32 %v2050_v59, %v2816_v6  ;;  %v1195_v63 = vpop.f32.mrb[51].mxu0  ;;  %v1289_v52 = vmax.f32 %v1201_v10, 0.0 }
 0x417   : > { %v1196_v49 = vadd.f32 %v2816_v6, %v1195_v63  ;;  %v1287_v43 = vmax.f32 %v1193_v2, 0.0 }
 0x418   : > { %v1290_v50 = vmax.f32 %v1204_v11, 0.0 }
 0x419   : > { %v1288_v45 = vmax.f32 %v1196_v49, 0.0 }
 0x41a   : > { %v1312_v47 = vpack.c.bf16 %v1290_v50, %v1289_v52 }
 0x41b   : > { %v1311_v7 = vpack.c.bf16 %v1288_v45, %v1287_v43 }
 0x41d   : > { %1324 = vmatpush1.bf16.msra.mxu1 %v1311_v7 }
 0x41e   : > { %1325 = vmatprep.subr.bf16.mxu1 %v2293_v1 }
 0x421   : > { %1326 = vmatpush1.bf16.msra.mxu1 %v1312_v47 }
 0x422   : > { %1327 = vmatprep.subr.bf16.mxu1 %v2293_v1 }
 0x423   : > { %v2053_v9 = vpop.f32.mrb[52].mxu0 }
 0x424   : > { %v1217_v0 = vadd.f32 %v2053_v9, %v2816_v6  ;;  %v1208_v8 = vpop.f32.mrb[53].mxu0 }
 0x425   : > { %v1209_v59 = vadd.f32 %v2816_v6, %v1208_v8  ;;  %v2054_v13 = vpop.f32.mrb[54].mxu0 }
 0x426   : > { %v1220_v10 = vadd.f32 %v2054_v13, %v2816_v6  ;;  %v1211_v11 = vpop.f32.mrb[55].mxu0  ;;  %v1293_v63 = vmax.f32 %v1217_v0, 0.0 }
 0x427   : > { %v1212_v2 = vadd.f32 %v2816_v6, %v1211_v11  ;;  %v1291_v52 = vmax.f32 %v1209_v59, 0.0 }
 0x428   : > { %v1294_v49 = vmax.f32 %v1220_v10, 0.0 }
 0x429   : > { %v1292_v50 = vmax.f32 %v1212_v2, 0.0 }
 0x42a   : > { %v1314_v43 = vpack.c.bf16 %v1294_v49, %v1293_v63 }
 0x42b   : > { %v1313_v45 = vpack.c.bf16 %v1292_v50, %v1291_v52 }
 0x42d   : > { %1328 = vmatpush1.bf16.msra.mxu1 %v1313_v45 }
 0x42e   : > { %1329 = vmatprep.subr.bf16.mxu1 %v2293_v1 }
 0x431   : > { %1330 = vmatpush1.bf16.msra.mxu1 %v1314_v43 }
 0x432   : > { %1331 = vmatprep.subr.bf16.mxu1 %v2293_v1 }
 0x433   : > { %v2057_v47 = vpop.f32.mrb[56].mxu0 }
 0x434   : > { %v1233_v7 = vadd.f32 %v2057_v47, %v2816_v6  ;;  %v1224_v9 = vpop.f32.mrb[57].mxu0 }
 0x435   : > { %v1225_v13 = vadd.f32 %v2816_v6, %v1224_v9  ;;  %v2058_v8 = vpop.f32.mrb[58].mxu0 }
 0x436   : > { %v1236_v0 = vadd.f32 %v2058_v8, %v2816_v6  ;;  %v1227_v10 = vpop.f32.mrb[59].mxu0  ;;  %v1297_v11 = vmax.f32 %v1233_v7, 0.0 }
 0x437   : > { %v1228_v59 = vadd.f32 %v2816_v6, %v1227_v10  ;;  %v1295_v63 = vmax.f32 %v1225_v13, 0.0 }
 0x438   : > { %v1298_v2 = vmax.f32 %v1236_v0, 0.0 }
 0x439   : > { %v1296_v49 = vmax.f32 %v1228_v59, 0.0 }
 0x43a   : > { %v1316_v52 = vpack.c.bf16 %v1298_v2, %v1297_v11 }
 0x43b   : > { %v1315_v50 = vpack.c.bf16 %v1296_v49, %v1295_v63 }
 0x43d   : > { %1332 = vmatpush1.bf16.msra.mxu1 %v1315_v50 }
 0x43e   : > { %1333 = vmatprep.subr.bf16.mxu1 %v2293_v1 }
 0x441   : > { %1334 = vmatpush1.bf16.msra.mxu1 %v1316_v52 }
 0x442   : > { %1335 = vmatprep.subr.bf16.mxu1 %v2293_v1 }
 0x443   : > { %v2061_v43 = vpop.f32.mrb[60].mxu0 }
 0x444   : > { %v1249_v45 = vadd.f32 %v2061_v43, %v2816_v6  ;;  %v1240_v47 = vpop.f32.mrb[61].mxu0 }
 0x445   : > { %v1241_v9 = vadd.f32 %v2816_v6, %v1240_v47  ;;  %v2062_v8 = vpop.f32.mrb[62].mxu0 }
 0x446   : > { %v1252_v7 = vadd.f32 %v2062_v8, %v2816_v6  ;;  %v1243_v0 = vpop.f32.mrb[63].mxu0  ;;  %v1301_v10 = vmax.f32 %v1249_v45, 0.0 }
 0x447   : > { %v1244_v13 = vadd.f32 %v2816_v6, %v1243_v0  ;;  %v1299_v11 = vmax.f32 %v1241_v9, 0.0 }
 0x448   : > { %v1302_v59 = vmax.f32 %v1252_v7, 0.0 }
 0x449   : > { %v1300_v2 = vmax.f32 %v1244_v13, 0.0 }
 0x44a   : > { %v1318_v63 = vpack.c.bf16 %v1302_v59, %v1301_v10 }
 0x44b   : > { %v1317_v49 = vpack.c.bf16 %v1300_v2, %v1299_v11 }
 0x44d   : > { %1336 = vmatpush1.bf16.msra.mxu1 %v1317_v49 }
 0x44e   : > { %1337 = vmatprep.subr.bf16.mxu1 %v2293_v1 }
 0x451   : > { %1338 = vmatpush1.bf16.msra.mxu1 %v1318_v63 }
 0x452   : > { %1339 = vmatprep.subr.bf16.mxu1 %v2293_v1 }
 0x453   : > { %v2065_v52 = vpop.f32.mrb[64].mxu0 }
 0x454   : > { %v1265_v50 = vadd.f32 %v2065_v52, %v2816_v6  ;;  %v1256_v43 = vpop.f32.mrb[65].mxu0 }
 0x455   : > { %v1257_v47 = vadd.f32 %v2816_v6, %v1256_v43  ;;  %v2066_v8 = vpop.f32.mrb[66].mxu0 }
 0x456   : > { %v1268_v45 = vadd.f32 %v2066_v8, %v2816_v6  ;;  %v1259_v7 = vpop.f32.mrb[67].mxu0  ;;  %v1305_v0 = vmax.f32 %v1265_v50, 0.0 }
 0x457   : > { %v1260_v9 = vadd.f32 %v2816_v6, %v1259_v7  ;;  %v1303_v10 = vmax.f32 %v1257_v47, 0.0 }
 0x458   : > { %v1306_v13 = vmax.f32 %v1268_v45, 0.0 }
 0x459   : > { %v1304_v59 = vmax.f32 %v1260_v9, 0.0 }
 0x45a   : > { %v1320_v11 = vpack.c.bf16 %v1306_v13, %v1305_v0 }
 0x45b   : > { %v1319_v2 = vpack.c.bf16 %v1304_v59, %v1303_v10 }
 0x45d   : > { %1340 = vmatpush1.bf16.msra.mxu1 %v1319_v2 }
 0x45e   : > { %1341 = vmatprep.subr.bf16.mxu1 %v2293_v1 }
 0x461   : > { %1342 = vmatpush1.bf16.msra.mxu1 %v1320_v11 }
 0x462   : > { %1343 = vmatprep.subr.bf16.mxu1 %v2293_v1 }
 0x463   : > { %v2069_v63 = vpop.f32.mrb[68].mxu0 }
 0x464   : > { %v1281_v49 = vadd.f32 %v2069_v63, %v2816_v6  ;;  %v1272_v52 = vpop.f32.mrb[69].mxu0 }
 0x465   : > { %v1273_v43 = vadd.f32 %v2816_v6, %v1272_v52  ;;  %v2070_v8 = vpop.f32.mrb[70].mxu0 }
 0x466   : > { %v1284_v50 = vadd.f32 %v2070_v8, %v2816_v6  ;;  %v1275_v45 = vpop.f32.mrb[71].mxu0  ;;  %v1309_v7 = vmax.f32 %v1281_v49, 0.0 }
 0x467   : > { %v1276_v47 = vadd.f32 %v2816_v6, %v1275_v45  ;;  %v1307_v0 = vmax.f32 %v1273_v43, 0.0 }
 0x468   : > { %v1310_v9 = vmax.f32 %v1284_v50, 0.0 }
 0x469   : > { %v1308_v13 = vmax.f32 %v1276_v47, 0.0 }
 0x46a   : > { %v1322_v10 = vpack.c.bf16 %v1310_v9, %v1309_v7 }
 0x46b   : > { %v1321_v59 = vpack.c.bf16 %v1308_v13, %v1307_v0 }
 0x46d   : > { %1344 = vmatpush1.bf16.msra.mxu1 %v1321_v59 }
 0x46e   : > { %1345 = vmatprep.subr.bf16.mxu1 %v2293_v1  ;;  %v2227_v1 = vld [vmem:[%s3056_s7] sm:$0xff]  }
 0x46f   : > { %2071 = vmatprep.subr.bf16.mxu0 %v2227_v1 }
 0x470   : > { %2072 = vmatpush3.bf16.msra.mxu0 %v2227_v1 }
 0x471   : > { %1346 = vmatpush1.bf16.msra.mxu1 %v1322_v10 }
 0x474   : > { %1356 = vmatmul.mubr.bf16.vlgmr.msra.gmra.mrb[72].mxu1 %v2434_v14  ;;  %v2228_v14 = vld [vmem:[%s3056_s7 + $0x8] sm:$0xff]  }
 0x475   : > { %1945 = vmatprep.mubr.msk.bf16.mxu1 %vm562_vm0, %v2439_v15  ;;  %2073 = vmatprep.subr.bf16.mxu0 %v2228_v14 }
 0x476   : > { %2074 = vmatpush3.bf16.msra.mxu0 %v2228_v14 }
 0x47c   : > { %1364 = vmatmul.mubr.bf16.gmra.mrb[76].mxu1 %v2447_v16 }
 0x47d   : > { %1946 = vmatprep.mubr.msk.bf16.mxu1 %vm562_vm0, %v2452_v17 }
 0x484   : > { %1372 = vmatmul.mubr.bf16.gmra.mrb[80].mxu1 %v2460_v18 }
 0x485   : > { %1947 = vmatprep.mubr.msk.bf16.mxu1 %vm562_vm0, %v2465_v19 }
 0x48c   : > { %1380 = vmatmul.mubr.bf16.gmra.mrb[84].mxu1 %v2473_v20 }
 0x48d   : > { %1948 = vmatprep.mubr.msk.bf16.mxu1 %vm562_vm0, %v2478_v21 }
 0x494   : > { %1388 = vmatmul.mubr.bf16.gmra.mrb[88].mxu1 %v2486_v22 }
 0x495   : > { %1949 = vmatprep.mubr.msk.bf16.mxu1 %vm562_vm0, %v2491_v23 }
 0x49c   : > { %1396 = vmatmul.mubr.bf16.gmra.mrb[92].mxu1 %v2499_v24 }
 0x49d   : > { %1950 = vmatprep.mubr.msk.bf16.mxu1 %vm562_vm0, %v2504_v25 }
 0x4a4   : > { %1404 = vmatmul.mubr.bf16.gmra.mrb[96].mxu1 %v2512_v26 }
 0x4a5   : > { %1951 = vmatprep.mubr.msk.bf16.mxu1 %vm562_vm0, %v2517_v27 }
 0x4ac   : > { %1412 = vmatmul.mubr.bf16.gmra.mrb[100].mxu1 %v2525_v28 }
 0x4ad   : > { %1952 = vmatprep.mubr.msk.bf16.mxu1 %vm562_vm0, %v2530_v29 }
 0x4b4   : > { %1420 = vmatmul.mubr.bf16.gmra.mrb[104].mxu1 %v2538_v30 }
 0x4b5   : > { %1953 = vmatprep.mubr.msk.bf16.mxu1 %vm562_vm0, %v2543_v31 }
 0x4bc   : > { %1428 = vmatmul.mubr.bf16.gmra.mrb[108].mxu1 %v2551_v32 }
 0x4bd   : > { %1954 = vmatprep.mubr.msk.bf16.mxu1 %vm562_vm0, %v2556_v33 }
 0x4c4   : > { %1436 = vmatmul.mubr.bf16.gmra.mrb[112].mxu1 %v2564_v34 }
 0x4c5   : > { %1955 = vmatprep.mubr.msk.bf16.mxu1 %vm562_vm0, %v2569_v35 }
 0x4cc   : > { %1444 = vmatmul.mubr.bf16.gmra.mrb[116].mxu1 %v2577_v36 }
 0x547   : > { %v1357_v15 = vpop.f32.mrb[72].mxu1 }
 0x548   : > { %v1359_v16 = vpop.f32.mrb[73].mxu1 }
 0x549   : > { %v1360_v17 = vpop.f32.mrb[74].mxu1 }
 0x54a   : > { %v1452_v18 = vpack.c.bf16 %v1360_v17, %v1357_v15  ;;  %v1362_v19 = vpop.f32.mrb[75].mxu1 }
 0x54c   : > { %2075 = vmatprep.mubr.msk.bf16.mxu0 %vm1121_vm2, %v1452_v18 }
 0x54f   : > { %v1365_v20 = vpop.f32.mrb[76].mxu1 }
 0x550   : > { %v1367_v21 = vpop.f32.mrb[77].mxu1 }
 0x551   : > { %v1368_v22 = vpop.f32.mrb[78].mxu1 }
 0x552   : > { %v1453_v23 = vpack.c.bf16 %v1368_v22, %v1365_v20  ;;  %v1370_v24 = vpop.f32.mrb[79].mxu1 }
 0x554   : > { %2076 = vmatmul.mubr.msk.bf16.vlgmr.msra.gmra.mrb[72].mxu0 %vm1121_vm2, %v1453_v23 }
 0x557   : > { %v1373_v25 = vpop.f32.mrb[80].mxu1 }
 0x558   : > { %v1375_v26 = vpop.f32.mrb[81].mxu1 }
 0x559   : > { %v1376_v27 = vpop.f32.mrb[82].mxu1 }
 0x55a   : > { %v1454_v28 = vpack.c.bf16 %v1376_v27, %v1373_v25  ;;  %v1378_v29 = vpop.f32.mrb[83].mxu1 }
 0x55c   : > { %2079 = vmatprep.mubr.msk.bf16.mxu0 %vm1121_vm2, %v1454_v28 }
 0x55f   : > { %v1381_v30 = vpop.f32.mrb[84].mxu1 }
 0x560   : > { %v1383_v31 = vpop.f32.mrb[85].mxu1 }
 0x561   : > { %v1384_v32 = vpop.f32.mrb[86].mxu1 }
 0x562   : > { %v1455_v33 = vpack.c.bf16 %v1384_v32, %v1381_v30  ;;  %v1386_v34 = vpop.f32.mrb[87].mxu1 }
 0x563   : > { %v2294_v34 = vmov 0.0|0.0  }
 0x564   : > { %2080 = vmatmul.mubr.msk.bf16.gmra.mrb[76].mxu0 %vm1121_vm2, %v1455_v33  ;;  %2099 = vmatprep.subr.bf16.mxu0 %v2294_v34 }
 0x567   : > { %v1389_v35 = vpop.f32.mrb[88].mxu1 }
 0x568   : > { %v1391_v36 = vpop.f32.mrb[89].mxu1 }
 0x569   : > { %v1392_v6 = vpop.f32.mrb[90].mxu1  ;;  %v2913_v36 = vld [vmem:[%s3057_s8] ss:$0 sm:$0xff] }
 0x56a   : > { %v1456_v11 = vpack.c.bf16 %v1392_v6, %v1389_v35  ;;  %v1394_v2 = vpop.f32.mrb[91].mxu1  ;;  %v1701_v35 = vld [vmem:[%s3050_s1 + $0x8] sm:$0xff] }
 0x56c   : > { %2083 = vmatprep.mubr.msk.bf16.mxu0 %vm1121_vm2, %v1456_v11 }
 0x56f   : > { %v1397_v63 = vpop.f32.mrb[92].mxu1 }
 0x570   : > { %v1399_v49 = vpop.f32.mrb[93].mxu1 }
 0x571   : > { %v1400_v52 = vpop.f32.mrb[94].mxu1 }
 0x572   : > { %v1457_v43 = vpack.c.bf16 %v1400_v52, %v1397_v63  ;;  %v1402_v8 = vpop.f32.mrb[95].mxu1 }
 0x574   : > { %2084 = vmatmul.mubr.msk.bf16.gmra.mrb[80].mxu0 %vm1121_vm2, %v1457_v43 }
 0x577   : > { %v1405_v50 = vpop.f32.mrb[96].mxu1 }
 0x578   : > { %v1407_v45 = vpop.f32.mrb[97].mxu1 }
 0x579   : > { %v1408_v47 = vpop.f32.mrb[98].mxu1 }
 0x57a   : > { %v1458_v7 = vpack.c.bf16 %v1408_v47, %v1405_v50  ;;  %v1410_v9 = vpop.f32.mrb[99].mxu1 }
 0x57b   : > { %v3087_v9 = vmax.f32 %v2613_v5, 0.0 }
 0x57c   : > { %2087 = vmatprep.mubr.msk.bf16.mxu0 %vm1121_vm2, %v1458_v7 }
 0x57f   : > { %v1413_v0 = vpop.f32.mrb[100].mxu1 }
 0x580   : > { %v1415_v13 = vpop.f32.mrb[101].mxu1 }
 0x581   : > { %v1416_v10 = vpop.f32.mrb[102].mxu1  ;;  %v3088_v13 = vmax.f32 %v2607_v3, 0.0 }
 0x582   : > { %v1459_v59 = vpack.c.bf16 %v1416_v10, %v1413_v0  ;;  %v1418_v1 = vpop.f32.mrb[103].mxu1 }
 0x584   : > { %2088 = vmatmul.mubr.msk.bf16.gmra.mrb[84].mxu0 %vm1121_vm2, %v1459_v59  ;;  %v3089_v59 = vmax.f32 %v2604_v62, 0.0 }
 0x587   : > { %v1421_v14 = vpop.f32.mrb[104].mxu1 }
 0x588   : > { %v1423_v15 = vpop.f32.mrb[105].mxu1 }
 0x589   : > { %v1424_v16 = vpop.f32.mrb[106].mxu1 }
 0x58a   : > { %v1460_v17 = vpack.c.bf16 %v1424_v16, %v1421_v14  ;;  %v1426_v18 = vpop.f32.mrb[107].mxu1  ;;  %v3090_v14 = vmax.f32 %v2610_v4, 0.0 }
 0x58c   : > { %2091 = vmatprep.mubr.msk.bf16.mxu0 %vm1121_vm2, %v1460_v17 }
 0x58f   : > { %v1429_v19 = vpop.f32.mrb[108].mxu1 }
 0x590   : > { %v1431_v20 = vpop.f32.mrb[109].mxu1 }
 0x591   : > { %v1432_v21 = vpop.f32.mrb[110].mxu1 }
 0x592   : > { %v1461_v22 = vpack.c.bf16 %v1432_v21, %v1429_v19  ;;  %v1434_v23 = vpop.f32.mrb[111].mxu1 }
 0x594   : > { %2092 = vmatmul.mubr.msk.bf16.gmra.mrb[88].mxu0 %vm1121_vm2, %v1461_v22 }
 0x597   : > { %v1437_v24 = vpop.f32.mrb[112].mxu1 }
 0x598   : > { %v1439_v25 = vpop.f32.mrb[113].mxu1 }
 0x599   : > { %v1440_v26 = vpop.f32.mrb[114].mxu1 }
 0x59a   : > { %v1462_v27 = vpack.c.bf16 %v1440_v26, %v1437_v24  ;;  %v1442_v28 = vpop.f32.mrb[115].mxu1  ;;  %v3091_v26 = vmax.f32 %v2639_v42, 0.0 }
 0x59b   : > { %v3092_v28 = vmax.f32 %v2633_v40, 0.0 }
 0x59c   : > { %2095 = vmatprep.mubr.msk.bf16.mxu0 %vm1121_vm2, %v1462_v27 }
 0x59f   : > { %v1445_v29 = vpop.f32.mrb[116].mxu1 }
 0x5a0   : > { %v1447_v30 = vpop.f32.mrb[117].mxu1 }
 0x5a1   : > { %v1448_v31 = vpop.f32.mrb[118].mxu1  ;;  %v3093_v30 = vmax.f32 %v2630_v37, 0.0 }
 0x5a2   : > { %v1463_v32 = vpack.c.bf16 %v1448_v31, %v1445_v29  ;;  %v1450_v33 = vpop.f32.mrb[119].mxu1 }
 0x5a4   : > { %2096 = vmatmul.mubr.msk.bf16.gmra.mrb[92].mxu0 %vm1121_vm2, %v1463_v32  ;;  %v3094_v32 = vmax.f32 %v2636_v41, 0.0 }
 0x5a5   : > { %1971 = vmatprep.mubr.msk.f32.mxu0 %vm562_vm0, %v1701_v35 }
 0x627   : > { %v2077_v6 = vpop.f32.mrb[72].mxu0 }
 0x628   : > { %v1566_v11 = vadd.f32 %v2077_v6, %v2913_v36  ;;  %v1557_v2 = vpop.f32.mrb[73].mxu0 }
 0x629   : > { %v1558_v63 = vadd.f32 %v2913_v36, %v1557_v2  ;;  %v2078_v49 = vpop.f32.mrb[74].mxu0 }
 0x62a   : > { %v1654_v52 = vmax.f32 %v1566_v11, 0.0  ;;  %v1569_v43 = vadd.f32 %v2078_v49, %v2913_v36  ;;  %v1560_v8 = vpop.f32.mrb[75].mxu0 }
 0x62b   : > { %v1652_v50 = vmax.f32 %v1558_v63, 0.0  ;;  %v1561_v45 = vadd.f32 %v2913_v36, %v1560_v8 }
 0x62c   : > { %v1655_v47 = vmax.f32 %v1569_v43, 0.0  ;;  %v1678_v0 = vadd.f32 %v1654_v52, %v3087_v9 }
 0x62d   : > { %v1653_v7 = vmax.f32 %v1561_v45, 0.0  ;;  %v1676_v1 = vadd.f32 %v1652_v50, %v3089_v59  ;;  %v3095_v45 = vmax.f32 %v2665_v56, 0.0 }
 0x62e   : > { %v1679_v10 = vadd.f32 %v1655_v47, %v3088_v13 }
 0x62f   : > { %v1677_v15 = vadd.f32 %v1653_v7, %v3090_v14  ;;  %v3096_v7 = vmax.f32 %v2659_v54, 0.0 }
 0x630   : > { %v2103_v16 = vpack.c.bf16 %v1679_v10, %v1678_v0  ;;  %v3097_v0 = vmax.f32 %v2656_v51, 0.0  ;;  %v3098_v10 = vmax.f32 %v2662_v55, 0.0 }
 0x631   : > { %v2100_v17 = vpack.c.bf16 %v1677_v15, %v1676_v1 }
 0x633   : > { %2101 = vmatpush1.bf16.msra.mxu0 %v2100_v17 }
 0x634   : > { %2102 = vmatprep.subr.bf16.mxu0 %v2294_v34 }
 0x637   : > { %v2081_v18 = vpop.f32.mrb[76].mxu0  ;;  %2104 = vmatpush1.bf16.msra.mxu0 %v2103_v16 }
 0x638   : > { %v1582_v19 = vadd.f32 %v2081_v18, %v2913_v36  ;;  %v1573_v5 = vpop.f32.mrb[77].mxu0  ;;  %2105 = vmatprep.subr.bf16.mxu0 %v2294_v34 }
 0x639   : > { %v1574_v3 = vadd.f32 %v2913_v36, %v1573_v5  ;;  %v2082_v20 = vpop.f32.mrb[78].mxu0 }
 0x63a   : > { %v1658_v62 = vmax.f32 %v1582_v19, 0.0  ;;  %v1585_v21 = vadd.f32 %v2082_v20, %v2913_v36  ;;  %v1576_v4 = vpop.f32.mrb[79].mxu0 }
 0x63b   : > { %v1656_v22 = vmax.f32 %v1574_v3, 0.0  ;;  %v1577_v23 = vadd.f32 %v2913_v36, %v1576_v4  ;;  %v3100_v4 = vmax.f32 %v2685_v39, 0.0 }
 0x63c   : > { %v1659_v24 = vmax.f32 %v1585_v21, 0.0  ;;  %v1682_v27 = vadd.f32 %v1658_v62, %v3091_v26  ;;  %v3099_v62 = vmax.f32 %v2691_v48, 0.0 }
 0x63d   : > { %v1657_v25 = vmax.f32 %v1577_v23, 0.0  ;;  %v1680_v31 = vadd.f32 %v1656_v22, %v3093_v30  ;;  %v3101_v23 = vmax.f32 %v2682_v12, 0.0 }
 0x63e   : > { %v1683_v29 = vadd.f32 %v1659_v24, %v3092_v28 }
 0x63f   : > { %v1681_v33 = vadd.f32 %v1657_v25, %v3094_v32  ;;  %v3102_v25 = vmax.f32 %v2688_v46, 0.0 }
 0x640   : > { %v2109_v35 = vpack.c.bf16 %v1683_v29, %v1682_v27 }
 0x641   : > { %v2106_v6 = vpack.c.bf16 %v1681_v33, %v1680_v31 }
 0x643   : > { %2107 = vmatpush1.bf16.msra.mxu0 %v2106_v6 }
 0x644   : > { %2108 = vmatprep.subr.bf16.mxu0 %v2294_v34 }
 0x647   : > { %v2085_v11 = vpop.f32.mrb[80].mxu0  ;;  %2110 = vmatpush1.bf16.msra.mxu0 %v2109_v35 }
 0x648   : > { %v1598_v2 = vadd.f32 %v2085_v11, %v2913_v36  ;;  %v1589_v42 = vpop.f32.mrb[81].mxu0  ;;  %2111 = vmatprep.subr.bf16.mxu0 %v2294_v34 }
 0x649   : > { %v1590_v40 = vadd.f32 %v2913_v36, %v1589_v42  ;;  %v2086_v63 = vpop.f32.mrb[82].mxu0 }
 0x64a   : > { %v1662_v37 = vmax.f32 %v1598_v2, 0.0  ;;  %v1601_v49 = vadd.f32 %v2086_v63, %v2913_v36  ;;  %v1592_v41 = vpop.f32.mrb[83].mxu0  ;;  %v3103_v2 = vmax.f32 %v2720_v57, 0.0 }
 0x64b   : > { %v1660_v52 = vmax.f32 %v1590_v40, 0.0  ;;  %v1593_v43 = vadd.f32 %v2913_v36, %v1592_v41  ;;  %v3104_v40 = vmax.f32 %v2714_v53, 0.0  ;;  %v3106_v41 = vmax.f32 %v2717_v58, 0.0 }
 0x64c   : > { %v1663_v8 = vmax.f32 %v1601_v49, 0.0  ;;  %v1686_v47 = vadd.f32 %v1662_v37, %v3095_v45  ;;  %v3105_v37 = vmax.f32 %v2711_v38, 0.0 }
 0x64d   : > { %v1661_v50 = vmax.f32 %v1593_v43, 0.0  ;;  %v1684_v13 = vadd.f32 %v1660_v52, %v3097_v0 }
 0x64e   : > { %v1687_v9 = vadd.f32 %v1663_v8, %v3096_v7 }
 0x64f   : > { %v1685_v59 = vadd.f32 %v1661_v50, %v3098_v10 }
 0x650   : > { %v2115_v1 = vpack.c.bf16 %v1687_v9, %v1686_v47 }
 0x651   : > { %v2112_v14 = vpack.c.bf16 %v1685_v59, %v1684_v13  ;;  %v3107_v59 = vmax.f32 %v2746_v44, 0.0  ;;  %v1700_v44 = vld [vmem:[%s3050_s1] sm:$0xff] }
 0x653   : > { %2113 = vmatpush1.bf16.msra.mxu0 %v2112_v14  ;;  %v3108_v14 = vmax.f32 %v2740_v61, 0.0 }
 0x654   : > { %2114 = vmatprep.subr.bf16.mxu0 %v2294_v34 }
 0x657   : > { %v2089_v15 = vpop.f32.mrb[84].mxu0  ;;  %2116 = vmatpush1.bf16.msra.mxu0 %v2115_v1 }
 0x658   : > { %v1614_v16 = vadd.f32 %v2089_v15, %v2913_v36  ;;  %v1605_v56 = vpop.f32.mrb[85].mxu0  ;;  %2117 = vmatprep.subr.bf16.mxu0 %v2294_v34 }
 0x659   : > { %v1606_v54 = vadd.f32 %v2913_v36, %v1605_v56  ;;  %v2090_v17 = vpop.f32.mrb[86].mxu0 }
 0x65a   : > { %v1666_v51 = vmax.f32 %v1614_v16, 0.0  ;;  %v1617_v18 = vadd.f32 %v2090_v17, %v2913_v36  ;;  %v1608_v55 = vpop.f32.mrb[87].mxu0  ;;  %v3109_v16 = vmax.f32 %v2737_v60, 0.0 }
 0x65b   : > { %v1664_v19 = vmax.f32 %v1606_v54, 0.0  ;;  %v1609_v5 = vadd.f32 %v2913_v36, %v1608_v55  ;;  %v3110_v54 = vld [vmem:[#allocation5_spill] sm:$0xff] }
 0x65c   : > { %v1667_v3 = vmax.f32 %v1617_v18, 0.0  ;;  %v1690_v21 = vadd.f32 %v1666_v51, %v3099_v62  ;;  %v3111_v17 = vmax.f32 %v3110_v54, 0.0 }
 0x65d   : > { %v1665_v20 = vmax.f32 %v1609_v5, 0.0  ;;  %v1688_v24 = vadd.f32 %v1664_v19, %v3101_v23 }
 0x65e   : > { %v1691_v22 = vadd.f32 %v1667_v3, %v3100_v4 }
 0x65f   : > { %v1689_v26 = vadd.f32 %v1665_v20, %v3102_v25 }
 0x660   : > { %v2121_v27 = vpack.c.bf16 %v1691_v22, %v1690_v21 }
 0x661   : > { %v2118_v28 = vpack.c.bf16 %v1689_v26, %v1688_v24 }
 0x663   : > { %2119 = vmatpush1.bf16.msra.mxu0 %v2118_v28 }
 0x664   : > { %2120 = vmatprep.subr.bf16.mxu0 %v2294_v34 }
 0x667   : > { %v2093_v29 = vpop.f32.mrb[88].mxu0  ;;  %2122 = vmatpush1.bf16.msra.mxu0 %v2121_v27 }
 0x668   : > { %v1630_v30 = vadd.f32 %v2093_v29, %v2913_v36  ;;  %v1621_v48 = vpop.f32.mrb[89].mxu0  ;;  %2123 = vmatprep.subr.bf16.mxu0 %v2294_v34 }
 0x669   : > { %v1622_v39 = vadd.f32 %v2913_v36, %v1621_v48  ;;  %v2094_v31 = vpop.f32.mrb[90].mxu0 }
 0x66a   : > { %v1670_v12 = vmax.f32 %v1630_v30, 0.0  ;;  %v1633_v32 = vadd.f32 %v2094_v31, %v2913_v36  ;;  %v1624_v46 = vpop.f32.mrb[91].mxu0 }
 0x66b   : > { %v1668_v33 = vmax.f32 %v1622_v39, 0.0  ;;  %v1625_v35 = vadd.f32 %v2913_v36, %v1624_v46 }
 0x66c   : > { %v1671_v6 = vmax.f32 %v1633_v32, 0.0  ;;  %v1694_v42 = vadd.f32 %v1670_v12, %v3103_v2 }
 0x66d   : > { %v1669_v11 = vmax.f32 %v1625_v35, 0.0  ;;  %v1692_v49 = vadd.f32 %v1668_v33, %v3105_v37 }
 0x66e   : > { %v1695_v63 = vadd.f32 %v1671_v6, %v3104_v40 }
 0x66f   : > { %v1693_v52 = vadd.f32 %v1669_v11, %v3106_v41 }
 0x670   : > { %v2127_v43 = vpack.c.bf16 %v1695_v63, %v1694_v42 }
 0x671   : > { %v2124_v8 = vpack.c.bf16 %v1693_v52, %v1692_v49 }
 0x673   : > { %2125 = vmatpush1.bf16.msra.mxu0 %v2124_v8 }
 0x674   : > { %2126 = vmatprep.subr.bf16.mxu0 %v2294_v34 }
 0x677   : > { %v2097_v50 = vpop.f32.mrb[92].mxu0  ;;  %2128 = vmatpush1.bf16.msra.mxu0 %v2127_v43 }
 0x678   : > { %v1646_v45 = vadd.f32 %v2097_v50, %v2913_v36  ;;  %v1637_v57 = vpop.f32.mrb[93].mxu0  ;;  %2129 = vmatprep.subr.bf16.mxu0 %v2294_v34 }
 0x679   : > { %v1638_v53 = vadd.f32 %v2913_v36, %v1637_v57  ;;  %v2098_v47 = vpop.f32.mrb[94].mxu0 }
 0x67a   : > { %v1674_v38 = vmax.f32 %v1646_v45, 0.0  ;;  %v1649_v7 = vadd.f32 %v2098_v47, %v2913_v36  ;;  %v1640_v58 = vpop.f32.mrb[95].mxu0 }
 0x67b   : > { %v1672_v9 = vmax.f32 %v1638_v53, 0.0  ;;  %v1641_v0 = vadd.f32 %v2913_v36, %v1640_v58 }
 0x67c   : > { %v1675_v13 = vmax.f32 %v1649_v7, 0.0  ;;  %v1698_v1 = vadd.f32 %v1674_v38, %v3107_v59 }
 0x67d   : > { %v1673_v10 = vmax.f32 %v1641_v0, 0.0  ;;  %v1696_v56 = vadd.f32 %v1672_v9, %v3109_v16 }
 0x67e   : > { %v1699_v15 = vadd.f32 %v1675_v13, %v3108_v14 }
 0x67f   : > { %v1697_v51 = vadd.f32 %v1673_v10, %v3111_v17 }
 0x680   : > { %v2133_v18 = vpack.c.bf16 %v1699_v15, %v1698_v1 }
 0x681   : > { %v2130_v55 = vpack.c.bf16 %v1697_v51, %v1696_v56 }
 0x683   : > { %2131 = vmatpush1.bf16.msra.mxu0 %v2130_v55 }
 0x684   : > { %2132 = vmatprep.subr.bf16.mxu0 %v2294_v34 }
 0x687   : > { %2134 = vmatpush1.bf16.msra.mxu0 %v2133_v18 }
 0x68a   : > { %1770 = vmatmul.mubr.f32.vlgmr.msra.gmra.mrb[96].mxu0 %v1700_v44 }
 0x75d   : > { %v1771_v60 = vpop.f32.mrb[96].mxu0 }
 0x75e   : > { %1775 = vst.msk [vmem:[%s326_s25] sm:$0xff] %vm1121_vm2, %v1771_v60  ;;  %v1773_v61 = vpop.f32.mrb[97].mxu0 }
 0x75f   : > { %2242 = shalt.err (!%p2239_p3)
}
 0x760   : > { %s2243_s22 = scalar_lea.hbm %s3006_s29, 128  ;;  %s2247_s25 = scalar_lea.hbm %s3058_s9, 256 }
 0x761   : > { %p2244_p4 = scmp.ne.s32.totalorder %s3006_s29, %s2243_s22  ;;  %p2248_p9 = scmp.lt.u32.totalorder %s3006_s29, %s3058_s9 }
 0x762   : > { %p2249_p10 = scmp.lt.u32.totalorder %s2247_s25, %s2243_s22  ;;  %p2251_p12 = scmp.lt.u32.totalorder %s2243_s22, %s3006_s29 }
 0x763   : > { %p2245_p7 = pnand %p2244_p4, %p2384_p5 }
 0x764   : > { %p2250_p11 = por %p2249_p10, %p2248_p9 }
 0x765   : > { %p2246_p8 = pneg %p2245_p7 }
 0x766   : > { %p2252_p13 = por %p2251_p12, %p2250_p11 }
 0x768   : > { %p2253_p0 = pnand %p2252_p13, %p2246_p8 }
 0x76a   : > { %2256 = shalt.err (!%p2253_p0)
}
 0x76b   : > { %2135 = dma.vmem_to_hbm [thread:$0]  (%p2384_p5), %s3008_s26, 128, %s3006_s29, %s1777_s14  }
 0x76c PF: > { %p2141_p1 = scmp.ge.s32.totalorder %s2291_s12, 2  ;;  %s1802_s16 = sand.u32 1, %s2279_s30  }
 0x76d   : > { %s1803_s13 = scalar_lea.sflag [#allocation3], %s1802_s16 }
 0x76e   : > { %p2138_p2 = pnand %p2141_p1, %p2388_p6 }
 0x770   : > { %2274 = dma.done.wait (!%p2138_p2), %s1803_s13, 128  }
 0x771   : > { %2276 = vsyncadd (!%p2138_p2), %s1803_s13, 4294967168  ;;  %p19_p3 = scmp.ge.s32.totalorder %s2371_s15, 4   ;;  %s3112_s30 = smov %s2283_s10 }
 0x772   : > { %s3113_s10 = smov %s2287_s11  ;;  %s3114_s11 = smov %s2382_s18 }
 0x773   : > { %s3115_s12 = smov %s2371_s15  ;;  %21 = sbr.rel (!%p19_p3) target bundleno = 3 (0x3), region = 91 }
 0x77a   :  { %1808 = vsyncpa [#allocation3], 1 }
 0x77b   :  { %1810 = vsyncpa [#allocation3 + $0x1], 1 }

</bundles_post_ra>
